<compile_context>
chip_gen: v7x
topology: tpu7x:2x2x1
jax: 0.10.0
libtpu: 0.0.40
codegen_flags: <defaults>
</compile_context>

<pallas_src>
import jax
import jax.numpy as jnp
from jax.experimental import pallas as pl
from jax.experimental.pallas import tpu as pltpu


def _round_up(x, m):
    return ((x + m - 1) // m) * m


def _pick_tile(rows8, target):
    """Largest multiple-of-8 tile <= target that exactly divides rows8.

    Prefers a tile giving >=2 grid steps when rows8 is large enough, so the
    'parallel' grid axis can shard across v7x's 2 TensorCores and the
    pipeline has something to overlap; falls back to one full-size step for
    tiny row counts (avoids many sub-µs grid steps of pure overhead)."""
    upper = min(target, rows8 // 2) if rows8 >= 128 else rows8
    upper = max(8, (upper // 8) * 8)
    for t in range(upper, 0, -8):
        if rows8 % t == 0:
            return t
    return rows8


# ----------------------------- Pallas kernels ------------------------------

def _conv_tanh_pool_kernel(cols_ref, w_ref, b_ref, o_ref):
    """Fused conv(GEMM) + bias + tanh + 2x2 avg-pool epilogue.

    cols_ref: (4, tm, K) bf16 -- im2col rows for the 4 pool-window members
    w_ref:    (K, OC)    bf16 -- (kh,kw,ic)->oc weight (natural K, no pad)
    b_ref:    (1, OC)    f32
    o_ref:    (tm, OC)   bf16 -- pooled, tanh'd output rows
    """
    w = w_ref[...]
    # Hoist the (1,OC)->(tm,OC) bias broadcast out of the unrolled pool loop.
    bb = jnp.broadcast_to(b_ref[...], o_ref.shape)
    acc = jnp.zeros(o_ref.shape, jnp.float32)
    for p in range(4):  # static unroll over the 2x2 pool window
        y = jnp.dot(cols_ref[p], w, preferred_element_type=jnp.float32)
        acc = acc + jnp.tanh(y + bb)
    o_ref[...] = (acc * 0.25).astype(o_ref.dtype)


def _fc_stack_kernel(x_ref, w1_ref, b1_ref, w2_ref, b2_ref, w3_ref, b3_ref,
                     o_ref):
    """Fused fc1+tanh -> fc2+tanh -> fc3.  All weights VMEM-resident; hidden
    and output widths are lane-padded to 128 (full-lane unmasked stores)."""
    h = jnp.dot(x_ref[...], w1_ref[...], preferred_element_type=jnp.float32)
    h = jnp.tanh(h + b1_ref[...]).astype(w2_ref.dtype)
    h = jnp.dot(h, w2_ref[...], preferred_element_type=jnp.float32)
    h = jnp.tanh(h + b2_ref[...]).astype(w3_ref.dtype)
    h = jnp.dot(h, w3_ref[...], preferred_element_type=jnp.float32)
    o_ref[...] = (h + b3_ref[...]).astype(o_ref.dtype)


# ------------------------------ Wrappers -----------------------------------

def conv_tanh_pool(x_nhwc, w_k_oc, bias_1oc, k, *, tile_rows=128):
    """Conv2d(k, stride=1, pad=0) + Tanh + AvgPool2d(2,2), NHWC in/out (bf16).

    Patch extraction (layout glue) stays in XLA; the GEMM + tanh + pool run in
    one Pallas kernel, tiled over pooled output rows.
    """
    N, H, W, C = x_nhwc.shape
    OH, OW = H - k + 1, W - k + 1
    PH, PW = OH // 2, OW // 2
    K = k * k * C
    OC = w_k_oc.shape[1]
    Mp = N * PH * PW

    # im2col rows grouped by 2x2 pool-window member (r, s); natural K.
    shards = []
    for r in (0, 1):
        for s in (0, 1):
            cols = []
            for dh in range(k):
                for dw in range(k):
                    cols.append(x_nhwc[:, r + dh:r + dh + 2 * PH:2,
                                       s + dw:s + dw + 2 * PW:2, :])
            # (N, PH, PW, k*k, C) -> (Mp, K), feature order (kh, kw, ic)
            shards.append(jnp.stack(cols, axis=3).reshape(Mp, K))
    slabs = jnp.stack(shards, axis=0)                       # (4, Mp, K) bf16

    mp8 = _round_up(Mp, 8)
    if mp8 != Mp:                      # <= 7 garbage rows, sliced off below
        slabs = jnp.pad(slabs, ((0, 0), (0, mp8 - Mp), (0, 0)))
    tm = _pick_tile(mp8, tile_rows)

    out = pl.pallas_call(
        _conv_tanh_pool_kernel,
        out_shape=jax.ShapeDtypeStruct((mp8, OC), jnp.bfloat16),
        grid=(mp8 // tm,),
        in_specs=[
            # TODO(synk): if v6e profiling shows exposed slab DMA, add
            # pipeline_mode=pl.Buffered(3) on this spec.
            pl.BlockSpec((4, tm, K), lambda i: (0, i, 0)),
            pl.BlockSpec((K, OC), lambda i: (0, 0)),
            pl.BlockSpec((1, OC), lambda i: (0, 0)),
        ],
        out_specs=pl.BlockSpec((tm, OC), lambda i: (i, 0)),
        compiler_params=pltpu.CompilerParams(
            dimension_semantics=("parallel",)),
    )(slabs, w_k_oc, bias_1oc)
    return out[:Mp].reshape(N, PH, PW, OC)


def fc_stack(x, w1, b1, w2, b2, w3, b3, num_classes, *, tile_rows=256):
    """Fused fc1->tanh->fc2->tanh->fc3. x: (N, 400) bf16, out: (N, NC) f32."""
    N, K = x.shape
    H1 = w1.shape[1]      # 128 (lane-padded)
    H2 = w2.shape[1]      # 128 (lane-padded)
    NCp = w3.shape[1]     # 128 (lane-padded)

    n8 = _round_up(N, 8)
    xp = jnp.pad(x, ((0, n8 - N), (0, 0))) if n8 != N else x
    tn = _pick_tile(n8, tile_rows)

    out = pl.pallas_call(
        _fc_stack_kernel,
        out_shape=jax.ShapeDtypeStruct((n8, NCp), jnp.float32),
        grid=(n8 // tn,),
        in_specs=[
            pl.BlockSpec((tn, K), lambda i: (i, 0)),
            pl.BlockSpec((K, H1), lambda i: (0, 0)),
            pl.BlockSpec((1, H1), lambda i: (0, 0)),
            pl.BlockSpec((H1, H2), lambda i: (0, 0)),
            pl.BlockSpec((1, H2), lambda i: (0, 0)),
            pl.BlockSpec((H2, NCp), lambda i: (0, 0)),
            pl.BlockSpec((1, NCp), lambda i: (0, 0)),
        ],
        out_specs=pl.BlockSpec((tn, NCp), lambda i: (i, 0)),
        compiler_params=pltpu.CompilerParams(
            dimension_semantics=("parallel",)),
    )(xp, w1, b1, w2, b2, w3, b3)
    return out[:N, :num_classes]


# ------------------------ Parameter preparation ----------------------------

def prepare_params(params):
    """One-time weight reorder / transpose / pad / bf16 cast (outside jit)."""
    f32 = jnp.float32
    H1P = H2P = NCP = 128   # lane-dense FC widths

    def conv_weight(w_oihw):
        oc, ic, kh, kw = w_oihw.shape
        w = jnp.transpose(w_oihw, (2, 3, 1, 0)).reshape(kh * kw * ic, oc)
        return w.astype(jnp.bfloat16)          # natural K (no zero-padding)

    def pad_fc(w_kn, kpad, npad):
        k, n = w_kn.shape
        return jnp.pad(w_kn, ((0, kpad - k), (0, npad - n))).astype(jnp.bfloat16)

    def pad_bias(b, npad):
        return jnp.pad(b.reshape(1, -1), ((0, 0), (0, npad - b.shape[0]))).astype(f32)

    # Fold the torch.nn.Flatten (c,h,w) ordering into fc1's weight so the
    # forward pass can flatten the NHWC activation directly (no transpose).
    fc1_w = params["fc1_w"]                                    # (120, 400)
    fc1_w = fc1_w.reshape(-1, 16, 5, 5).transpose(0, 2, 3, 1).reshape(-1, 400)

    return {
        "conv1_w": conv_weight(params["conv1_w"]),             # (75, 6)
        "conv1_b": params["conv1_b"].reshape(1, -1).astype(f32),
        "conv2_w": conv_weight(params["conv2_w"]),             # (150, 16)
        "conv2_b": params["conv2_b"].reshape(1, -1).astype(f32),
        "fc1_w": pad_fc(fc1_w.T, 400, H1P),                    # (400, 128)
        "fc1_b": pad_bias(params["fc1_b"], H1P),
        "fc2_w": pad_fc(params["fc2_w"].T, H1P, H2P),          # (128, 128)
        "fc2_b": pad_bias(params["fc2_b"], H2P),
        "fc3_w": pad_fc(params["fc3_w"].T, H2P, NCP),          # (128, 128)
        "fc3_b": pad_bias(params["fc3_b"], NCP),
    }


# ------------------------------ Forward ------------------------------------

def lenet5_forward(x_nchw, p, num_classes=10):
    x = jnp.transpose(x_nchw, (0, 2, 3, 1)).astype(jnp.bfloat16)  # NCHW->NHWC
    x = conv_tanh_pool(x, p["conv1_w"], p["conv1_b"], 5)          # (N,14,14,6)
    x = conv_tanh_pool(x, p["conv2_w"], p["conv2_b"], 5)          # (N,5,5,16)
    n = x.shape[0]
    x = x.reshape(n, 5 * 5 * 16)   # NHWC flatten; perm folded into fc1_w
    # TODO(synk): at small batch, fuse conv2's GEMM+pool epilogue with the FC
    # stack (its pooled output is exactly the 400-feature fc1 input) to drop a
    # pallas_call launch and one HBM round-trip of the (N,5,5,16) activation.
    return fc_stack(x, p["fc1_w"], p["fc1_b"], p["fc2_w"], p["fc2_b"],
                    p["fc3_w"], p["fc3_b"], num_classes)


def init_params(key, num_classes=10):
    """Deterministic PyTorch-default-style init (uniform(+-1/sqrt(fan_in)))."""
    keys = jax.random.split(key, 10)

    def u(k, shape, fan_in):
        bound = 1.0 / jnp.sqrt(jnp.float32(fan_in))
        return jax.random.uniform(k, shape, jnp.float32, -bound, bound)

    return {
        "conv1_w": u(keys[0], (6, 3, 5, 5), 3 * 25),
        "conv1_b": u(keys[1], (6,), 3 * 25),
        "conv2_w": u(keys[2], (16, 6, 5, 5), 6 * 25),
        "conv2_b": u(keys[3], (16,), 6 * 25),
        "fc1_w": u(keys[4], (120, 16 * 5 * 5), 16 * 5 * 5),
        "fc1_b": u(keys[5], (120,), 16 * 5 * 5),
        "fc2_w": u(keys[6], (84, 120), 120),
        "fc2_b": u(keys[7], (84,), 120),
        "fc3_w": u(keys[8], (num_classes, 84), 84),
        "fc3_b": u(keys[9], (num_classes,), 84),
    }


if __name__ == "__main__":
    key = jax.random.PRNGKey(0)
    kx, kp = jax.random.split(key)
    # LeNet-5 needs 32x32 spatial input (fc1 expects 16*5*5 features).
    x = jax.random.normal(kx, (2, 3, 32, 32), jnp.float32)   # NCHW like PyTorch
    params = init_params(kp, num_classes=10)
    prepped = prepare_params(params)                         # one-time reorders

    out = jax.jit(lenet5_forward)(x, prepped)
    out = jax.block_until_ready(out)
    assert out.shape == (2, 10) and out.dtype == jnp.float32
    print("KERNEL_OK")
</pallas_src>

<mosaic_0001>
module attributes {stable_mosaic.version = 11 : i64} {
  func.func @_conv_tanh_pool_kernel(%arg0: i32, %arg1: memref<4x56x75xbf16, #tpu.memory_space<vmem>>, %arg2: memref<75x6xbf16, #tpu.memory_space<vmem>>, %arg3: memref<1x6xf32, #tpu.memory_space<vmem>>, %arg4: memref<56x6xbf16, #tpu.memory_space<vmem>>) attributes {dimension_semantics = [#tpu.dimension_semantics<parallel>], iteration_bounds = array<i64: 7>, scalar_prefetch = 0 : i64, scratch_operands = 0 : i64, tpu.core_type = #tpu.core_type<tc>, window_params = [{transform_indices = @transform_0, window_bounds = array<i64: 4, 56, 75>}, {pipeline_mode = #tpu.pipeline_mode<synchronous>, transform_indices = @transform_1, window_bounds = array<i64: 75, 6>}, {pipeline_mode = #tpu.pipeline_mode<synchronous>, transform_indices = @transform_2, window_bounds = array<i64: 1, 6>}, {transform_indices = @transform_3, window_bounds = array<i64: 56, 6>}]} {
    %c0 = arith.constant 0 : index
    %c0_0 = arith.constant 0 : index
    %0 = vector.load %arg2[%c0, %c0_0] : memref<75x6xbf16, #tpu.memory_space<vmem>>, vector<75x6xbf16>
    %c0_1 = arith.constant 0 : index
    %c0_2 = arith.constant 0 : index
    %1 = vector.load %arg3[%c0_1, %c0_2] : memref<1x6xf32, #tpu.memory_space<vmem>>, vector<1x6xf32>
    %2 = vector.shape_cast %1 : vector<1x6xf32> to vector<1x6xf32>
    %3 = vector.broadcast %2 : vector<1x6xf32> to vector<56x6xf32>
    %cst = arith.constant 0.000000e+00 : f32
    %4 = vector.broadcast %cst : f32 to vector<56x6xf32>
    %c0_3 = arith.constant 0 : index
    %c0_4 = arith.constant 0 : index
    %c0_5 = arith.constant 0 : index
    %5 = vector.load %arg1[%c0_3, %c0_4, %c0_5] : memref<4x56x75xbf16, #tpu.memory_space<vmem>>, vector<1x56x75xbf16>
    %6 = vector.shape_cast %5 : vector<1x56x75xbf16> to vector<56x75xbf16>
    %cst_6 = arith.constant dense<0.000000e+00> : vector<56x6xf32>
    %7 = tpu.matmul %6, %0, %cst_6 {dimension_numbers = #tpu.dot_dimension_numbers<[1], [0], [0], [1], [0, 0, 1, 1], [], []>} : vector<56x75xbf16>, vector<75x6xbf16>, vector<56x6xf32> -> vector<56x6xf32>
    %8 = arith.addf %7, %3 : vector<56x6xf32>
    %9 = math.tanh %8 : vector<56x6xf32>
    %10 = arith.addf %4, %9 : vector<56x6xf32>
    %c1 = arith.constant 1 : index
    %c0_7 = arith.constant 0 : index
    %c0_8 = arith.constant 0 : index
    %11 = vector.load %arg1[%c1, %c0_7, %c0_8] : memref<4x56x75xbf16, #tpu.memory_space<vmem>>, vector<1x56x75xbf16>
    %12 = vector.shape_cast %11 : vector<1x56x75xbf16> to vector<56x75xbf16>
    %cst_9 = arith.constant dense<0.000000e+00> : vector<56x6xf32>
    %13 = tpu.matmul %12, %0, %cst_9 {dimension_numbers = #tpu.dot_dimension_numbers<[1], [0], [0], [1], [0, 0, 1, 1], [], []>} : vector<56x75xbf16>, vector<75x6xbf16>, vector<56x6xf32> -> vector<56x6xf32>
    %14 = arith.addf %13, %3 : vector<56x6xf32>
    %15 = math.tanh %14 : vector<56x6xf32>
    %16 = arith.addf %10, %15 : vector<56x6xf32>
    %c2 = arith.constant 2 : index
    %c0_10 = arith.constant 0 : index
    %c0_11 = arith.constant 0 : index
    %17 = vector.load %arg1[%c2, %c0_10, %c0_11] : memref<4x56x75xbf16, #tpu.memory_space<vmem>>, vector<1x56x75xbf16>
    %18 = vector.shape_cast %17 : vector<1x56x75xbf16> to vector<56x75xbf16>
    %cst_12 = arith.constant dense<0.000000e+00> : vector<56x6xf32>
    %19 = tpu.matmul %18, %0, %cst_12 {dimension_numbers = #tpu.dot_dimension_numbers<[1], [0], [0], [1], [0, 0, 1, 1], [], []>} : vector<56x75xbf16>, vector<75x6xbf16>, vector<56x6xf32> -> vector<56x6xf32>
    %20 = arith.addf %19, %3 : vector<56x6xf32>
    %21 = math.tanh %20 : vector<56x6xf32>
    %22 = arith.addf %16, %21 : vector<56x6xf32>
    %c3 = arith.constant 3 : index
    %c0_13 = arith.constant 0 : index
    %c0_14 = arith.constant 0 : index
    %23 = vector.load %arg1[%c3, %c0_13, %c0_14] : memref<4x56x75xbf16, #tpu.memory_space<vmem>>, vector<1x56x75xbf16>
    %24 = vector.shape_cast %23 : vector<1x56x75xbf16> to vector<56x75xbf16>
    %cst_15 = arith.constant dense<0.000000e+00> : vector<56x6xf32>
    %25 = tpu.matmul %24, %0, %cst_15 {dimension_numbers = #tpu.dot_dimension_numbers<[1], [0], [0], [1], [0, 0, 1, 1], [], []>} : vector<56x75xbf16>, vector<75x6xbf16>, vector<56x6xf32> -> vector<56x6xf32>
    %26 = arith.addf %25, %3 : vector<56x6xf32>
    %27 = math.tanh %26 : vector<56x6xf32>
    %28 = arith.addf %22, %27 : vector<56x6xf32>
    %cst_16 = arith.constant 2.500000e-01 : f32
    %29 = vector.broadcast %cst_16 : f32 to vector<56x6xf32>
    %30 = arith.mulf %28, %29 : vector<56x6xf32>
    %31 = arith.truncf %30 : vector<56x6xf32> to vector<56x6xbf16>
    %c0_17 = arith.constant 0 : index
    %c0_18 = arith.constant 0 : index
    %32 = vector.load %arg4[%c0_17, %c0_18] : memref<56x6xbf16, #tpu.memory_space<vmem>>, vector<56x6xbf16>
    tpu.vector_store %arg4[%c0_17, %c0_18], %31 {strides = array<i32>} : memref<56x6xbf16, #tpu.memory_space<vmem>>, vector<56x6xbf16>,
    return
  }
  func.func @transform_0(%arg0: i32) -> (i32, i32, i32) {
    %c0_i32 = arith.constant 0 : i32
    %c0_i32_0 = arith.constant 0 : i32
    %c0_i32_1 = arith.constant 0 : i32
    return %c0_i32, %arg0, %c0_i32_0 : i32, i32, i32
  }
  func.func @transform_1(%arg0: i32) -> (i32, i32) {
    %c0_i32 = arith.constant 0 : i32
    %c0_i32_0 = arith.constant 0 : i32
    %c0_i32_1 = arith.constant 0 : i32
    return %c0_i32, %c0_i32_0 : i32, i32
  }
  func.func @transform_2(%arg0: i32) -> (i32, i32) {
    %c0_i32 = arith.constant 0 : i32
    %c0_i32_0 = arith.constant 0 : i32
    %c0_i32_1 = arith.constant 0 : i32
    return %c0_i32, %c0_i32_0 : i32, i32
  }
  func.func @transform_3(%arg0: i32) -> (i32, i32) {
    %c0_i32 = arith.constant 0 : i32
    %c0_i32_0 = arith.constant 0 : i32
    return %arg0, %c0_i32 : i32, i32
  }
}

module attributes {stable_mosaic.version = 11 : i64} {
  func.func @_conv_tanh_pool_kernel(%arg0: i32, %arg1: memref<4x56x150xbf16, #tpu.memory_space<vmem>>, %arg2: memref<150x16xbf16, #tpu.memory_space<vmem>>, %arg3: memref<1x16xf32, #tpu.memory_space<vmem>>, %arg4: memref<56x16xbf16, #tpu.memory_space<vmem>>) attributes {dimension_semantics = [#tpu.dimension_semantics<parallel>], iteration_bounds = array<i64: 1>, scalar_prefetch = 0 : i64, scratch_operands = 0 : i64, tpu.core_type = #tpu.core_type<tc>, window_params = [{transform_indices = @transform_0, window_bounds = array<i64: 4, 56, 150>}, {pipeline_mode = #tpu.pipeline_mode<synchronous>, transform_indices = @transform_1, window_bounds = array<i64: 150, 16>}, {pipeline_mode = #tpu.pipeline_mode<synchronous>, transform_indices = @transform_2, window_bounds = array<i64: 1, 16>}, {transform_indices = @transform_3, window_bounds = array<i64: 56, 16>}]} {
    %c0 = arith.constant 0 : index
    %c0_0 = arith.constant 0 : index
    %0 = vector.load %arg2[%c0, %c0_0] : memref<150x16xbf16, #tpu.memory_space<vmem>>, vector<150x16xbf16>
    %c0_1 = arith.constant 0 : index
    %c0_2 = arith.constant 0 : index
    %1 = vector.load %arg3[%c0_1, %c0_2] : memref<1x16xf32, #tpu.memory_space<vmem>>, vector<1x16xf32>
    %2 = vector.shape_cast %1 : vector<1x16xf32> to vector<1x16xf32>
    %3 = vector.broadcast %2 : vector<1x16xf32> to vector<56x16xf32>
    %cst = arith.constant 0.000000e+00 : f32
    %4 = vector.broadcast %cst : f32 to vector<56x16xf32>
    %c0_3 = arith.constant 0 : index
    %c0_4 = arith.constant 0 : index
    %c0_5 = arith.constant 0 : index
    %5 = vector.load %arg1[%c0_3, %c0_4, %c0_5] : memref<4x56x150xbf16, #tpu.memory_space<vmem>>, vector<1x56x150xbf16>
    %6 = vector.shape_cast %5 : vector<1x56x150xbf16> to vector<56x150xbf16>
    %cst_6 = arith.constant dense<0.000000e+00> : vector<56x16xf32>
    %7 = tpu.matmul %6, %0, %cst_6 {dimension_numbers = #tpu.dot_dimension_numbers<[1], [0], [0], [1], [0, 0, 1, 1], [], []>} : vector<56x150xbf16>, vector<150x16xbf16>, vector<56x16xf32> -> vector<56x16xf32>
    %8 = arith.addf %7, %3 : vector<56x16xf32>
    %9 = math.tanh %8 : vector<56x16xf32>
    %10 = arith.addf %4, %9 : vector<56x16xf32>
    %c1 = arith.constant 1 : index
    %c0_7 = arith.constant 0 : index
    %c0_8 = arith.constant 0 : index
    %11 = vector.load %arg1[%c1, %c0_7, %c0_8] : memref<4x56x150xbf16, #tpu.memory_space<vmem>>, vector<1x56x150xbf16>
    %12 = vector.shape_cast %11 : vector<1x56x150xbf16> to vector<56x150xbf16>
    %cst_9 = arith.constant dense<0.000000e+00> : vector<56x16xf32>
    %13 = tpu.matmul %12, %0, %cst_9 {dimension_numbers = #tpu.dot_dimension_numbers<[1], [0], [0], [1], [0, 0, 1, 1], [], []>} : vector<56x150xbf16>, vector<150x16xbf16>, vector<56x16xf32> -> vector<56x16xf32>
    %14 = arith.addf %13, %3 : vector<56x16xf32>
    %15 = math.tanh %14 : vector<56x16xf32>
    %16 = arith.addf %10, %15 : vector<56x16xf32>
    %c2 = arith.constant 2 : index
    %c0_10 = arith.constant 0 : index
    %c0_11 = arith.constant 0 : index
    %17 = vector.load %arg1[%c2, %c0_10, %c0_11] : memref<4x56x150xbf16, #tpu.memory_space<vmem>>, vector<1x56x150xbf16>
    %18 = vector.shape_cast %17 : vector<1x56x150xbf16> to vector<56x150xbf16>
    %cst_12 = arith.constant dense<0.000000e+00> : vector<56x16xf32>
    %19 = tpu.matmul %18, %0, %cst_12 {dimension_numbers = #tpu.dot_dimension_numbers<[1], [0], [0], [1], [0, 0, 1, 1], [], []>} : vector<56x150xbf16>, vector<150x16xbf16>, vector<56x16xf32> -> vector<56x16xf32>
    %20 = arith.addf %19, %3 : vector<56x16xf32>
    %21 = math.tanh %20 : vector<56x16xf32>
    %22 = arith.addf %16, %21 : vector<56x16xf32>
    %c3 = arith.constant 3 : index
    %c0_13 = arith.constant 0 : index
    %c0_14 = arith.constant 0 : index
    %23 = vector.load %arg1[%c3, %c0_13, %c0_14] : memref<4x56x150xbf16, #tpu.memory_space<vmem>>, vector<1x56x150xbf16>
    %24 = vector.shape_cast %23 : vector<1x56x150xbf16> to vector<56x150xbf16>
    %cst_15 = arith.constant dense<0.000000e+00> : vector<56x16xf32>
    %25 = tpu.matmul %24, %0, %cst_15 {dimension_numbers = #tpu.dot_dimension_numbers<[1], [0], [0], [1], [0, 0, 1, 1], [], []>} : vector<56x150xbf16>, vector<150x16xbf16>, vector<56x16xf32> -> vector<56x16xf32>
    %26 = arith.addf %25, %3 : vector<56x16xf32>
    %27 = math.tanh %26 : vector<56x16xf32>
    %28 = arith.addf %22, %27 : vector<56x16xf32>
    %cst_16 = arith.constant 2.500000e-01 : f32
    %29 = vector.broadcast %cst_16 : f32 to vector<56x16xf32>
    %30 = arith.mulf %28, %29 : vector<56x16xf32>
    %31 = arith.truncf %30 : vector<56x16xf32> to vector<56x16xbf16>
    %c0_17 = arith.constant 0 : index
    %c0_18 = arith.constant 0 : index
    %32 = vector.load %arg4[%c0_17, %c0_18] : memref<56x16xbf16, #tpu.memory_space<vmem>>, vector<56x16xbf16>
    tpu.vector_store %arg4[%c0_17, %c0_18], %31 {strides = array<i32>} : memref<56x16xbf16, #tpu.memory_space<vmem>>, vector<56x16xbf16>,
    return
  }
  func.func @transform_0(%arg0: i32) -> (i32, i32, i32) {
    %c0_i32 = arith.constant 0 : i32
    %c0_i32_0 = arith.constant 0 : i32
    %c0_i32_1 = arith.constant 0 : i32
    return %c0_i32, %arg0, %c0_i32_0 : i32, i32, i32
  }
  func.func @transform_1(%arg0: i32) -> (i32, i32) {
    %c0_i32 = arith.constant 0 : i32
    %c0_i32_0 = arith.constant 0 : i32
    %c0_i32_1 = arith.constant 0 : i32
    return %c0_i32, %c0_i32_0 : i32, i32
  }
  func.func @transform_2(%arg0: i32) -> (i32, i32) {
    %c0_i32 = arith.constant 0 : i32
    %c0_i32_0 = arith.constant 0 : i32
    %c0_i32_1 = arith.constant 0 : i32
    return %c0_i32, %c0_i32_0 : i32, i32
  }
  func.func @transform_3(%arg0: i32) -> (i32, i32) {
    %c0_i32 = arith.constant 0 : i32
    %c0_i32_0 = arith.constant 0 : i32
    return %arg0, %c0_i32 : i32, i32
  }
}

module attributes {stable_mosaic.version = 11 : i64} {
  func.func @_fc_stack_kernel(%arg0: i32, %arg1: memref<8x400xbf16, #tpu.memory_space<vmem>>, %arg2: memref<400x128xbf16, #tpu.memory_space<vmem>>, %arg3: memref<1x128xf32, #tpu.memory_space<vmem>>, %arg4: memref<128x128xbf16, #tpu.memory_space<vmem>>, %arg5: memref<1x128xf32, #tpu.memory_space<vmem>>, %arg6: memref<128x128xbf16, #tpu.memory_space<vmem>>, %arg7: memref<1x128xf32, #tpu.memory_space<vmem>>, %arg8: memref<8x128xf32, #tpu.memory_space<vmem>>) attributes {dimension_semantics = [#tpu.dimension_semantics<parallel>], iteration_bounds = array<i64: 1>, scalar_prefetch = 0 : i64, scratch_operands = 0 : i64, tpu.core_type = #tpu.core_type<tc>, window_params = [{transform_indices = @transform_0, window_bounds = array<i64: 8, 400>}, {pipeline_mode = #tpu.pipeline_mode<synchronous>, transform_indices = @transform_1, window_bounds = array<i64: 400, 128>}, {pipeline_mode = #tpu.pipeline_mode<synchronous>, transform_indices = @transform_2, window_bounds = array<i64: 1, 128>}, {pipeline_mode = #tpu.pipeline_mode<synchronous>, transform_indices = @transform_3, window_bounds = array<i64: 128, 128>}, {pipeline_mode = #tpu.pipeline_mode<synchronous>, transform_indices = @transform_4, window_bounds = array<i64: 1, 128>}, {pipeline_mode = #tpu.pipeline_mode<synchronous>, transform_indices = @transform_5, window_bounds = array<i64: 128, 128>}, {pipeline_mode = #tpu.pipeline_mode<synchronous>, transform_indices = @transform_6, window_bounds = array<i64: 1, 128>}, {transform_indices = @transform_7, window_bounds = array<i64: 8, 128>}]} {
    %c0 = arith.constant 0 : index
    %c0_0 = arith.constant 0 : index
    %0 = vector.load %arg1[%c0, %c0_0] : memref<8x400xbf16, #tpu.memory_space<vmem>>, vector<8x400xbf16>
    %c0_1 = arith.constant 0 : index
    %c0_2 = arith.constant 0 : index
    %1 = vector.load %arg2[%c0_1, %c0_2] : memref<400x128xbf16, #tpu.memory_space<vmem>>, vector<400x128xbf16>
    %cst = arith.constant dense<0.000000e+00> : vector<8x128xf32>
    %2 = tpu.matmul %0, %1, %cst {dimension_numbers = #tpu.dot_dimension_numbers<[1], [0], [0], [1], [0, 0, 1, 1], [], []>} : vector<8x400xbf16>, vector<400x128xbf16>, vector<8x128xf32> -> vector<8x128xf32>
    %c0_3 = arith.constant 0 : index
    %c0_4 = arith.constant 0 : index
    %3 = vector.load %arg3[%c0_3, %c0_4] : memref<1x128xf32, #tpu.memory_space<vmem>>, vector<1x128xf32>
    %4 = vector.broadcast %3 : vector<1x128xf32> to vector<8x128xf32>
    %5 = arith.addf %2, %4 : vector<8x128xf32>
    %6 = math.tanh %5 : vector<8x128xf32>
    %7 = arith.truncf %6 : vector<8x128xf32> to vector<8x128xbf16>
    %c0_5 = arith.constant 0 : index
    %c0_6 = arith.constant 0 : index
    %8 = vector.load %arg4[%c0_5, %c0_6] : memref<128x128xbf16, #tpu.memory_space<vmem>>, vector<128x128xbf16>
    %cst_7 = arith.constant dense<0.000000e+00> : vector<8x128xf32>
    %9 = tpu.matmul %7, %8, %cst_7 {dimension_numbers = #tpu.dot_dimension_numbers<[1], [0], [0], [1], [0, 0, 1, 1], [], []>} : vector<8x128xbf16>, vector<128x128xbf16>, vector<8x128xf32> -> vector<8x128xf32>
    %c0_8 = arith.constant 0 : index
    %c0_9 = arith.constant 0 : index
    %10 = vector.load %arg5[%c0_8, %c0_9] : memref<1x128xf32, #tpu.memory_space<vmem>>, vector<1x128xf32>
    %11 = vector.broadcast %10 : vector<1x128xf32> to vector<8x128xf32>
    %12 = arith.addf %9, %11 : vector<8x128xf32>
    %13 = math.tanh %12 : vector<8x128xf32>
    %14 = arith.truncf %13 : vector<8x128xf32> to vector<8x128xbf16>
    %c0_10 = arith.constant 0 : index
    %c0_11 = arith.constant 0 : index
    %15 = vector.load %arg6[%c0_10, %c0_11] : memref<128x128xbf16, #tpu.memory_space<vmem>>, vector<128x128xbf16>
    %cst_12 = arith.constant dense<0.000000e+00> : vector<8x128xf32>
    %16 = tpu.matmul %14, %15, %cst_12 {dimension_numbers = #tpu.dot_dimension_numbers<[1], [0], [0], [1], [0, 0, 1, 1], [], []>} : vector<8x128xbf16>, vector<128x128xbf16>, vector<8x128xf32> -> vector<8x128xf32>
    %c0_13 = arith.constant 0 : index
    %c0_14 = arith.constant 0 : index
    %17 = vector.load %arg7[%c0_13, %c0_14] : memref<1x128xf32, #tpu.memory_space<vmem>>, vector<1x128xf32>
    %18 = vector.broadcast %17 : vector<1x128xf32> to vector<8x128xf32>
    %19 = arith.addf %16, %18 : vector<8x128xf32>
    %c0_15 = arith.constant 0 : index
    %c0_16 = arith.constant 0 : index
    %20 = vector.load %arg8[%c0_15, %c0_16] : memref<8x128xf32, #tpu.memory_space<vmem>>, vector<8x128xf32>
    tpu.vector_store %arg8[%c0_15, %c0_16], %19 {strides = array<i32>} : memref<8x128xf32, #tpu.memory_space<vmem>>, vector<8x128xf32>,
    return
  }
  func.func @transform_0(%arg0: i32) -> (i32, i32) {
    %c0_i32 = arith.constant 0 : i32
    %c0_i32_0 = arith.constant 0 : i32
    return %arg0, %c0_i32 : i32, i32
  }
  func.func @transform_1(%arg0: i32) -> (i32, i32) {
    %c0_i32 = arith.constant 0 : i32
    %c0_i32_0 = arith.constant 0 : i32
    %c0_i32_1 = arith.constant 0 : i32
    return %c0_i32, %c0_i32_0 : i32, i32
  }
  func.func @transform_2(%arg0: i32) -> (i32, i32) {
    %c0_i32 = arith.constant 0 : i32
    %c0_i32_0 = arith.constant 0 : i32
    %c0_i32_1 = arith.constant 0 : i32
    return %c0_i32, %c0_i32_0 : i32, i32
  }
  func.func @transform_3(%arg0: i32) -> (i32, i32) {
    %c0_i32 = arith.constant 0 : i32
    %c0_i32_0 = arith.constant 0 : i32
    %c0_i32_1 = arith.constant 0 : i32
    return %c0_i32, %c0_i32_0 : i32, i32
  }
  func.func @transform_4(%arg0: i32) -> (i32, i32) {
    %c0_i32 = arith.constant 0 : i32
    %c0_i32_0 = arith.constant 0 : i32
    %c0_i32_1 = arith.constant 0 : i32
    return %c0_i32, %c0_i32_0 : i32, i32
  }
  func.func @transform_5(%arg0: i32) -> (i32, i32) {
    %c0_i32 = arith.constant 0 : i32
    %c0_i32_0 = arith.constant 0 : i32
    %c0_i32_1 = arith.constant 0 : i32
    return %c0_i32, %c0_i32_0 : i32, i32
  }
  func.func @transform_6(%arg0: i32) -> (i32, i32) {
    %c0_i32 = arith.constant 0 : i32
    %c0_i32_0 = arith.constant 0 : i32
    %c0_i32_1 = arith.constant 0 : i32
    return %c0_i32, %c0_i32_0 : i32, i32
  }
  func.func @transform_7(%arg0: i32) -> (i32, i32) {
    %c0_i32 = arith.constant 0 : i32
    %c0_i32_0 = arith.constant 0 : i32
    return %arg0, %c0_i32 : i32, i32
  }
}

</mosaic_0001>

<bundles_post_ra>
// kernel: lenet5_forward.3
= control target key start
LH: loop header
LB: loop body
LE: loop exit
PB: predicated region body
PF: predicated region fallthrough
CT: control target
= control target key end

     0   :  { %s1287_s12 = smov 0   ;;  %s1289_s13 = smov 0   ;;  %s1477_s0 = inlined_call_operand.vmem [shape: bf16[4,392,75], index: 0, kind: input, shape index: {}]   ;;  %s1478_s1 = inlined_call_operand.vmem [shape: bf16[75,6], index: 1, kind: input, shape index: {}]   ;;  %s1479_s2 = inlined_call_operand.vmem [shape: f32[1,6], index: 2, kind: input, shape index: {}]   ;;  %s1480_s3 = inlined_call_operand.vmem [shape: bf16[392,6], index: 3, kind: output, shape index: {}]  }
   0x1   :  { %s1291_s14 = smov 0  }
   0x2 LB: > { %s947_s15 = sadd.s32 4294967295, %s1264_s14   ;;  %s1304_s16 = sadd.s32 1, %s1264_s14   ;;  %s1264_s14 = sphi %s1291_s14, %s1483_s14   ;;  %s1260_s13 = sphi %s1289_s13, %s1482_s13   ;;  %s1256_s12 = sphi %s1287_s12, %s1481_s12  }
   0x3   : > { %s17_s17 = ssub.s32 %s1264_s14, %s1304_s16  ;;  %s20_s18 = sadd.s32 1, %s1260_s13 }
   0x4   : > { %p18_p0 = scmp.eq.s32.totalorder %s17_s17, 0  ;;  %p27_p1 = scmp.ne.s32.totalorder %s1260_s13, %s1256_s12 }
   0x5   : > { %p28_p2 = scmp.eq.s32.totalorder %s1264_s14, 0  ;;  %p950_p4 = scmp.ge.s32.totalorder %s1264_s14, 7 }
   0x6   : > { %s1313_s19 = scalar_select %p18_p0, %s1260_s13, %s20_s18  }
   0x7   : > { %p29_p3 = por %p28_p2, %p27_p1  ;;  %127 = sbr.rel (%p950_p4) target bundleno = 27 (0x1b), region = 24 }
   0xe   : > { %130 = sbr.rel (!%p29_p3) target bundleno = 27 (0x1b), region = 28  ;;  %s132_s20 = sand.u32 (%p29_p3), 1, %s1260_s13  }
   0xf   : > { %s1022_s21 = smul.u32 (%p29_p3), 28, %s1264_s14 }
  0x10   : > { %s1138_s22 = smul.u32 (%p29_p3), 112, %s132_s20 }
  0x11   : > { %s1321_s25 = scalar_lea.vmem (%p29_p3), %s1477_s0, %s1022_s21 }
  0x12   : > { %v153_v0 = vld [vmem:[%s1321_s25] sm:$0xff] (%p29_p3)   ;;  %v157_v1 = vld [vmem:[%s1321_s25 + $0x8] sm:$0xff] (%p29_p3)   ;;  %v161_v2 = vld [vmem:[%s1321_s25 + $0x10] sm:$0xff] (%p29_p3)   ;;  %s134_s26 = scalar_lea.vmem (%p29_p3), [#allocation2], %s1138_s22 }
  0x13   : > { %154 = vst [vmem:[%s134_s26] sm:$0xff] (%p29_p3), %v153_v0   ;;  %158 = vst [vmem:[%s134_s26 + $0x8] sm:$0xff] (%p29_p3), %v157_v1   ;;  %v165_v3 = vld [vmem:[%s1321_s25 + $0x18] sm:$0xf] (%p29_p3)  ;;  %v167_v4 = vld [vmem:[%s1321_s25 + $0xc4] sm:$0xff] (%p29_p3)  }
  0x14   : > { %162 = vst [vmem:[%s134_s26 + $0x10] sm:$0xff] (%p29_p3), %v161_v2   ;;  %v171_v5 = vld [vmem:[%s1321_s25 + $0xcc] sm:$0xff] (%p29_p3)   ;;  %166 = vst [vmem:[%s134_s26 + $0x18] sm:$0xf] (%p29_p3), %v165_v3  ;;  %v175_v6 = vld [vmem:[%s1321_s25 + $0xd4] sm:$0xff] (%p29_p3)  }
  0x15   : > { %168 = vst [vmem:[%s134_s26 + $0x1c] sm:$0xff] %v167_v4   ;;  %172 = vst [vmem:[%s134_s26 + $0x24] sm:$0xff] %v171_v5   ;;  %v179_v7 = vld [vmem:[%s1321_s25 + $0xdc] sm:$0xf]  ;;  %v181_v8 = vld [vmem:[%s1321_s25 + $0x188] sm:$0xff]  }
  0x16   : > { %176 = vst [vmem:[%s134_s26 + $0x2c] sm:$0xff] %v175_v6   ;;  %180 = vst [vmem:[%s134_s26 + $0x34] sm:$0xf] %v179_v7  ;;  %v185_v9 = vld [vmem:[%s1321_s25 + $0x190] sm:$0xff]   ;;  %v189_v10 = vld [vmem:[%s1321_s25 + $0x198] sm:$0xff]  }
  0x17   : > { %182 = vst [vmem:[%s134_s26 + $0x38] sm:$0xff] %v181_v8   ;;  %v193_v11 = vld [vmem:[%s1321_s25 + $0x1a0] sm:$0xf]  ;;  %186 = vst [vmem:[%s134_s26 + $0x40] sm:$0xff] %v185_v9   ;;  %v195_v12 = vld [vmem:[%s1321_s25 + $0x24c] sm:$0xff]  }
  0x18   : > { %190 = vst [vmem:[%s134_s26 + $0x48] sm:$0xff] %v189_v10   ;;  %194 = vst [vmem:[%s134_s26 + $0x50] sm:$0xf] %v193_v11  ;;  %v199_v13 = vld [vmem:[%s1321_s25 + $0x254] sm:$0xff]   ;;  %v203_v14 = vld [vmem:[%s1321_s25 + $0x25c] sm:$0xff]  }
  0x19   : > { %196 = vst [vmem:[%s134_s26 + $0x54] sm:$0xff] %v195_v12   ;;  %200 = vst [vmem:[%s134_s26 + $0x5c] sm:$0xff] %v199_v13   ;;  %v207_v15 = vld [vmem:[%s1321_s25 + $0x264] sm:$0xf] }
  0x1a   : > { %204 = vst [vmem:[%s134_s26 + $0x64] sm:$0xff] %v203_v14   ;;  %208 = vst [vmem:[%s134_s26 + $0x6c] sm:$0xf] %v207_v15 }
  0x1b PF: > { %p952_p5 = scmp.ge.s32.totalorder %s1264_s14, 1  ;;  %p286_p6 = scmp.lt.s32.totalorder %s1264_s14, 8 }
  0x1d   : > { %p287_p7 = pnand %p952_p5, %p286_p6 }
  0x1e   : > { %v1165_v16 = vld [vmem:[%s1478_s1] sm:$0xff] (!%p287_p7)   ;;  %v1166_v17 = vld [vmem:[%s1478_s1 + $0x8] sm:$0xff] (!%p287_p7)   ;;  %vm408_vm0 = vcmask (!%p287_p7), 1044480   ;;  %v1167_v18 = vld [vmem:[%s1478_s1 + $0x10] sm:$0xff] (!%p287_p7)   ;;  %s293_s6 = sand.u32 (!%p287_p7), 1, %s1256_s12   ;;  %vm409_vm1 = vcmask (!%p287_p7), 1045504  }
  0x1f   : > { %290 = sbr.rel (%p287_p7) target bundleno = 317 (0x13d), region = 69  ;;  %1066 = vmatprep.subr.bf16.mxu0 (!%p287_p7), %v1165_v16  ;;  %1084 = vmatprep.subr.bf16.mxu1 (!%p287_p7), %v1165_v16  ;;  %v1266_v19 = vmov (!%p287_p7), 65535   ;;  %v1168_v21 = vld [vmem:[%s1478_s1 + $0x18] sm:$0xff] (!%p287_p7)   ;;  %v1169_v22 = vld [vmem:[%s1478_s1 + $0x20] sm:$0x3f] (!%p287_p7)   ;;  %vm395_vm2 = vcmask (!%p287_p7), 613376  }
  0x20   : > { %1067 = vmatpush3.bf16.msra.mxu0 (!%p287_p7), %v1165_v16  ;;  %1085 = vmatpush3.bf16.msra.mxu1 (!%p287_p7), %v1165_v16  ;;  %v410_v20 = vsel (!%p287_p7), %vm408_vm0, 4294967295, %v1266_v19  ;;  %s1139_s7 = smul.u32 (!%p287_p7), 112, %s293_s6  ;;  %v1394_v41 = vld [vmem:[%s1479_s2] ss:$0 sm:$0xff] (!%p287_p7)  ;;  %vm877_vm3 = vcmask (!%p287_p7), 44032  }
  0x21   : > { %1068 = vmatprep.subr.bf16.mxu0 (!%p287_p7), %v1166_v17  ;;  %1086 = vmatprep.subr.bf16.mxu1 (!%p287_p7), %v1166_v17  ;;  %v411_v23 = vsel (!%p287_p7), %vm409_vm1, %v410_v20, 0  ;;  %s317_s20 = smul.u32 (!%p287_p7), 7, %s947_s15 }
  0x22   : > { %s1357_s17 = scalar_lea.vmem (!%p287_p7), [#allocation2], %s1139_s7  ;;  %v413_v26 = vand.u32 (!%p287_p7), %v1169_v22, %v411_v23 }
  0x23   : > { %v1170_v24 = vld [vmem:[%s1357_s17] sm:$0xff] (!%p287_p7)   ;;  %v1172_v27 = vld [vmem:[%s1357_s17 + $0x8] sm:$0xff] (!%p287_p7)   ;;  %v1174_v29 = vld [vmem:[%s1357_s17 + $0x10] sm:$0xff] (!%p287_p7)   ;;  %p318_p8 = scmp.lt.s32.totalorder (!%p287_p7), %s317_s20, 48 }
  0x24   : > { %1069 = vmatpush3.bf16.msra.mxu0 (!%p287_p7), %v1166_v17  ;;  %1087 = vmatpush3.bf16.msra.mxu1 (!%p287_p7), %v1166_v17  ;;  %v1171_v25 = vld [vmem:[%s1357_s17 + $0x1c] sm:$0xff] (!%p287_p7)   ;;  %v1173_v28 = vld [vmem:[%s1357_s17 + $0x24] sm:$0xff] (!%p287_p7)   ;;  %v1175_v30 = vld [vmem:[%s1357_s17 + $0x2c] sm:$0xff] (!%p287_p7)  }
  0x25   : > { %1070 = vmatprep.subr.bf16.mxu0 (!%p287_p7), %v1167_v18  ;;  %1088 = vmatprep.subr.bf16.mxu1 (!%p287_p7), %v1167_v18  ;;  %v1176_v31 = vld [vmem:[%s1357_s17 + $0x18] ss:$0 sps:$4 sm:$0xff] (!%p287_p7)   ;;  %v1177_v32 = vld [vmem:[%s1357_s17 + $0x34] ss:$0 sps:$4 sm:$0xff] (!%p287_p7)   ;;  %v1180_v35 = vld [vmem:[%s1357_s17 + $0x40] sm:$0xff] (!%p287_p7)  }
  0x26   : > { %1076 = vmatprep.mubr.msk.bf16.mxu0 %vm395_vm2, %v1170_v24  ;;  %1094 = vmatprep.mubr.msk.bf16.mxu1 %vm395_vm2, %v1171_v25  ;;  %v1178_v33 = vld [vmem:[%s1357_s17 + $0x38] sm:$0xff]   ;;  %v1182_v37 = vld [vmem:[%s1357_s17 + $0x48] sm:$0xff]   ;;  %v1184_v39 = vld [vmem:[%s1357_s17 + $0x50] ss:$0 sps:$4 sm:$0xff]   ;;  %s1485_s20 = smov (!%p318_p8, %s317_s20), 48 }
  0x27   : > { %v1179_v34 = vld [vmem:[%s1357_s17 + $0x54] sm:$0xff]   ;;  %v1181_v36 = vld [vmem:[%s1357_s17 + $0x5c] sm:$0xff]   ;;  %v1183_v38 = vld [vmem:[%s1357_s17 + $0x64] sm:$0xff]   ;;  %s953_s14 = sshll.u32 %s1485_s20, 2 }
  0x28   : > { %1071 = vmatpush3.bf16.msra.mxu0 %v1167_v18  ;;  %1089 = vmatpush3.bf16.msra.mxu1 %v1167_v18  ;;  %v1185_v40 = vld [vmem:[%s1357_s17 + $0x6c] ss:$0 sps:$4 sm:$0xff]   ;;  %s1447_s22 = scalar_lea.vmem %s1480_s3, %s953_s14 }
  0x29   : > { %1072 = vmatprep.subr.bf16.mxu0 %v1168_v21  ;;  %1090 = vmatprep.subr.bf16.mxu1 %v1168_v21 }
  0x2c   : > { %1073 = vmatpush3.bf16.msra.mxu0 %v1168_v21  ;;  %1091 = vmatpush3.bf16.msra.mxu1 %v1168_v21 }
  0x2d   : > { %1074 = vmatprep.subr.bf16.mxu0 %v413_v26  ;;  %1092 = vmatprep.subr.bf16.mxu1 %v413_v26 }
  0x30   : > { %1075 = vmatpush3.bf16.msra.mxu0 %v413_v26  ;;  %1093 = vmatpush3.bf16.msra.mxu1 %v413_v26 }
  0x31   : > { %1102 = vmatprep.subr.bf16.mxu0 %v1165_v16  ;;  %1120 = vmatprep.subr.bf16.mxu1 %v1165_v16 }
  0x33   : > { %1077 = vmatmul.mubr.msk.bf16.vlgmr.msra.gmra.mrb[0].mxu0 %vm395_vm2, %v1172_v27  ;;  %1095 = vmatmul.mubr.msk.bf16.vlgmr.msra.gmra.mrb[0].mxu1 %vm395_vm2, %v1173_v28 }
  0x34   : > { %1103 = vmatpush3.bf16.msra.mxu0 %v1165_v16  ;;  %1121 = vmatpush3.bf16.msra.mxu1 %v1165_v16 }
  0x35   : > { %1104 = vmatprep.subr.bf16.mxu0 %v1166_v17  ;;  %1122 = vmatprep.subr.bf16.mxu1 %v1166_v17 }
  0x36   : > { %1080 = vmatprep.mubr.msk.bf16.mxu0 %vm395_vm2, %v1174_v29  ;;  %1098 = vmatprep.mubr.msk.bf16.mxu1 %vm395_vm2, %v1175_v30 }
  0x38   : > { %1105 = vmatpush3.bf16.msra.mxu0 %v1166_v17  ;;  %1123 = vmatpush3.bf16.msra.mxu1 %v1166_v17 }
  0x39   : > { %1106 = vmatprep.subr.bf16.mxu0 %v1167_v18  ;;  %1124 = vmatprep.subr.bf16.mxu1 %v1167_v18 }
  0x3b   : > { %1081 = vmatmul.mubr.msk.bf16.gmra.mrb[4].mxu0 %vm395_vm2, %v1176_v31  ;;  %1099 = vmatmul.mubr.msk.bf16.gmra.mrb[4].mxu1 %vm395_vm2, %v1177_v32 }
  0x3c   : > { %1107 = vmatpush3.bf16.msra.mxu0 %v1167_v18  ;;  %1125 = vmatpush3.bf16.msra.mxu1 %v1167_v18 }
  0x3d   : > { %1108 = vmatprep.subr.bf16.mxu0 %v1168_v21  ;;  %1126 = vmatprep.subr.bf16.mxu1 %v1168_v21 }
  0x3e   : > { %1112 = vmatprep.mubr.msk.bf16.mxu0 %vm395_vm2, %v1178_v33  ;;  %1130 = vmatprep.mubr.msk.bf16.mxu1 %vm395_vm2, %v1179_v34 }
  0x40   : > { %1109 = vmatpush3.bf16.msra.mxu0 %v1168_v21  ;;  %1127 = vmatpush3.bf16.msra.mxu1 %v1168_v21 }
  0x41   : > { %1110 = vmatprep.subr.bf16.mxu0 %v413_v26  ;;  %1128 = vmatprep.subr.bf16.mxu1 %v413_v26 }
  0x44   : > { %1111 = vmatpush3.bf16.msra.mxu0 %v413_v26  ;;  %1129 = vmatpush3.bf16.msra.mxu1 %v413_v26 }
  0x47   : > { %1113 = vmatmul.mubr.msk.bf16.vlgmr.msra.gmra.mrb[8].mxu0 %vm395_vm2, %v1180_v35  ;;  %1131 = vmatmul.mubr.msk.bf16.vlgmr.msra.gmra.mrb[8].mxu1 %vm395_vm2, %v1181_v36 }
  0x48   : > { %1116 = vmatprep.mubr.msk.bf16.mxu0 %vm395_vm2, %v1182_v37  ;;  %1134 = vmatprep.mubr.msk.bf16.mxu1 %vm395_vm2, %v1183_v38 }
  0x4f   : > { %1117 = vmatmul.mubr.msk.bf16.gmra.mrb[12].mxu0 %vm395_vm2, %v1184_v39  ;;  %1135 = vmatmul.mubr.msk.bf16.gmra.mrb[12].mxu1 %vm395_vm2, %v1185_v40 }
 0x106   : > { %v1078_v42 = vpop.f32.mrb[0].mxu0  ;;  %v1096_v43 = vpop.f32.mrb[0].mxu1 }
 0x107   : > { %v458_v44 = vadd.f32 %v1078_v42, %v1394_v41  ;;  %v574_v45 = vadd.f32 %v1096_v43, %v1394_v41  ;;  %v449_v46 = vpop.f32.mrb[1].mxu0  ;;  %v565_v47 = vpop.f32.mrb[1].mxu1 }
 0x108   : > { %v450_v48 = vadd.f32 %v1394_v41, %v449_v46  ;;  %v566_v49 = vadd.f32 %v1394_v41, %v565_v47  ;;  %v1079_v50 = vpop.f32.mrb[2].mxu0  ;;  %v1097_v51 = vpop.f32.mrb[2].mxu1 }
 0x109   : > { %1186 = vtanh.f32 %v458_v44  ;;  %v461_v52 = vadd.f32 %v1079_v50, %v1394_v41  ;;  %v452_v53 = vpop.f32.mrb[3].mxu0  ;;  %v568_v54 = vpop.f32.mrb[3].mxu1  ;;  %v577_v55 = vadd.f32 %v1097_v51, %v1394_v41 }
 0x10a   : > { %1188 = vtanh.f32 %v574_v45  ;;  %v453_v56 = vadd.f32 %v1394_v41, %v452_v53  ;;  %v569_v57 = vadd.f32 %v1394_v41, %v568_v54 }
 0x10b   : > { %1190 = vtanh.f32 %v450_v48 }
 0x10c   : > { %1192 = vtanh.f32 %v566_v49 }
 0x10d   : > { %1194 = vtanh.f32 %v461_v52 }
 0x10e   : > { %1196 = vtanh.f32 %v577_v55  ;;  %v1082_v58 = vpop.f32.mrb[4].mxu0  ;;  %v1100_v59 = vpop.f32.mrb[4].mxu1 }
 0x10f   : > { %1198 = vtanh.f32 %v453_v56  ;;  %v474_v60 = vadd.f32 %v1082_v58, %v1394_v41  ;;  %v590_v61 = vadd.f32 %v1100_v59, %v1394_v41  ;;  %v465_v62 = vpop.f32.mrb[5].mxu0  ;;  %v581_v63 = vpop.f32.mrb[5].mxu1 }
 0x110   : > { %1200 = vtanh.f32 %v569_v57  ;;  %v466_v0 = vadd.f32 %v1394_v41, %v465_v62  ;;  %v582_v1 = vadd.f32 %v1394_v41, %v581_v63  ;;  %v1083_v2 = vpop.f32.mrb[6].mxu0  ;;  %v1101_v3 = vpop.f32.mrb[6].mxu1 }
 0x111   : > { %1202 = vtanh.f32 %v474_v60  ;;  %v468_v4 = vpop.f32.mrb[7].mxu0  ;;  %v584_v5 = vpop.f32.mrb[7].mxu1 }
 0x112   : > { %1204 = vtanh.f32 %v590_v61  ;;  %v469_v6 = vadd.f32 %v1394_v41, %v468_v4  ;;  %v585_v7 = vadd.f32 %v1394_v41, %v584_v5 }
 0x113   : > { %v1187_v8 = vpop.eup %1186  ;;  %1206 = vtanh.f32 %v466_v0 }
 0x114   : > { %v1189_v9 = vpop.eup %1188  ;;  %1208 = vtanh.f32 %v582_v1 }
 0x115   : > { %v1191_v10 = vpop.eup %1190  ;;  %v1410_v11 = vadd.f32 %v1189_v9, %v1187_v8  ;;  %1210 = vtanh.f32 %v469_v6 }
 0x116   : > { %v1193_v12 = vpop.eup %1192  ;;  %1212 = vtanh.f32 %v585_v7 }
 0x117   : > { %v1195_v13 = vpop.eup %1194  ;;  %v1412_v14 = vadd.f32 %v1193_v12, %v1191_v10 }
 0x118   : > { %v1197_v15 = vpop.eup %1196 }
 0x119   : > { %v1199_v16 = vpop.eup %1198  ;;  %v1414_v17 = vadd.f32 %v1197_v15, %v1195_v13 }
 0x11a   : > { %v1201_v18 = vpop.eup %1200  ;;  %v1114_v19 = vpop.f32.mrb[8].mxu0 }
 0x11b   : > { %v1132_v20 = vpop.f32.mrb[8].mxu1  ;;  %v1203_v21 = vpop.eup %1202  ;;  %v1416_v22 = vadd.f32 %v1201_v18, %v1199_v16  ;;  %v690_v23 = vadd.f32 %v1114_v19, %v1394_v41 }
 0x11c   : > { %v806_v24 = vadd.f32 %v1132_v20, %v1394_v41  ;;  %v681_v25 = vpop.f32.mrb[9].mxu0  ;;  %v797_v26 = vpop.f32.mrb[9].mxu1 }
 0x11d   : > { %v1205_v27 = vpop.eup %1204  ;;  %v682_v28 = vadd.f32 %v1394_v41, %v681_v25  ;;  %v798_v29 = vadd.f32 %v1394_v41, %v797_v26  ;;  %v1115_v30 = vpop.f32.mrb[10].mxu0  ;;  %1214 = vtanh.f32 %v690_v23 }
 0x11e   : > { %v1133_v31 = vpop.f32.mrb[10].mxu1  ;;  %v1207_v32 = vpop.eup %1206  ;;  %v1422_v33 = vadd.f32 %v1205_v27, %v1203_v21  ;;  %v693_v34 = vadd.f32 %v1115_v30, %v1394_v41  ;;  %1216 = vtanh.f32 %v806_v24 }
 0x11f   : > { %v684_v35 = vpop.f32.mrb[11].mxu0  ;;  %v800_v36 = vpop.f32.mrb[11].mxu1  ;;  %v809_v38 = vadd.f32 %v1133_v31, %v1394_v41  ;;  %1218 = vtanh.f32 %v682_v28 }
 0x120   : > { %v1209_v37 = vpop.eup %1208  ;;  %v685_v42 = vadd.f32 %v1394_v41, %v684_v35  ;;  %1220 = vtanh.f32 %v798_v29  ;;  %v801_v44 = vadd.f32 %v1394_v41, %v800_v36 }
 0x121   : > { %v1211_v39 = vpop.eup %1210  ;;  %v1428_v40 = vadd.f32 %v1209_v37, %v1207_v32  ;;  %1222 = vtanh.f32 %v693_v34 }
 0x122   : > { %v1213_v43 = vpop.eup %1212  ;;  %1224 = vtanh.f32 %v809_v38  ;;  %v1118_v46 = vpop.f32.mrb[12].mxu0 }
 0x123   : > { %v1432_v45 = vadd.f32 %v1213_v43, %v1211_v39  ;;  %v1136_v47 = vpop.f32.mrb[12].mxu1  ;;  %1226 = vtanh.f32 %v685_v42  ;;  %v706_v48 = vadd.f32 %v1118_v46, %v1394_v41  ;;  %v697_v50 = vpop.f32.mrb[13].mxu0 }
 0x124   : > { %v822_v49 = vadd.f32 %v1136_v47, %v1394_v41  ;;  %v813_v51 = vpop.f32.mrb[13].mxu1  ;;  %1228 = vtanh.f32 %v801_v44  ;;  %v698_v52 = vadd.f32 %v1394_v41, %v697_v50  ;;  %v1119_v54 = vpop.f32.mrb[14].mxu0 }
 0x125   : > { %v814_v53 = vadd.f32 %v1394_v41, %v813_v51  ;;  %v1137_v55 = vpop.f32.mrb[14].mxu1  ;;  %1230 = vtanh.f32 %v706_v48  ;;  %v700_v56 = vpop.f32.mrb[15].mxu0 }
 0x126   : > { %v816_v57 = vpop.f32.mrb[15].mxu1  ;;  %1232 = vtanh.f32 %v822_v49  ;;  %v701_v58 = vadd.f32 %v1394_v41, %v700_v56 }
 0x127   : > { %v1215_v59 = vpop.eup %1214  ;;  %1234 = vtanh.f32 %v698_v52  ;;  %v817_v60 = vadd.f32 %v1394_v41, %v816_v57 }
 0x128   : > { %v1217_v61 = vpop.eup %1216  ;;  %v720_v62 = vadd.f32 %v1215_v59, %v1410_v11  ;;  %1236 = vtanh.f32 %v814_v53 }
 0x129   : > { %v1219_v63 = vpop.eup %1218  ;;  %1238 = vtanh.f32 %v701_v58 }
 0x12a   : > { %v1221_v0 = vpop.eup %1220  ;;  %v836_v1 = vadd.f32 %v1217_v61, %v720_v62  ;;  %v718_v2 = vadd.f32 %v1219_v63, %v1412_v14  ;;  %1240 = vtanh.f32 %v817_v60 }
 0x12b   : > { %v1223_v3 = vpop.eup %1222 }
 0x12c   : > { %v1225_v4 = vpop.eup %1224  ;;  %v843_v5 = vmul.f32 0.25, %v836_v1  ;;  %v834_v6 = vadd.f32 %v1221_v0, %v718_v2  ;;  %v721_v7 = vadd.f32 %v1223_v3, %v1414_v17 }
 0x12d   : > { %v1227_v8 = vpop.eup %1226 }
 0x12e   : > { %v1229_v41 = vpop.eup %1228  ;;  %v1025_v9 = vpack.c.bf16 %v843_v5, %v843_v5  ;;  %v841_v10 = vmul.f32 0.25, %v834_v6  ;;  %v837_v11 = vadd.f32 %v1225_v4, %v721_v7  ;;  %v719_v12 = vadd.f32 %v1227_v8, %v1416_v22 }
 0x12f   : > { %v1231_v13 = vpop.eup %1230 }
 0x130   : > { %v1233_v14 = vpop.eup %1232  ;;  %880 = vst.msk [vmem:[%s1447_s22 + $0x8] sm:$0xf] %vm877_vm3, %v1025_v9  ;;  %v1023_v15 = vpack.c.bf16 %v841_v10, %v841_v10  ;;  %v844_v16 = vmul.f32 0.25, %v837_v11  ;;  %v835_v17 = vadd.f32 %v1229_v41, %v719_v12  ;;  %v724_v18 = vadd.f32 %v1231_v13, %v1422_v33 }
 0x131   : > { %v1235_v19 = vpop.eup %1234 }
 0x132   : > { %v1237_v20 = vpop.eup %1236  ;;  %878 = vst.msk [vmem:[%s1447_s22] sm:$0xf] %vm877_vm3, %v1023_v15  ;;  %v1026_v21 = vpack.c.bf16 %v844_v16, %v844_v16  ;;  %v842_v23 = vmul.f32 0.25, %v835_v17  ;;  %v840_v24 = vadd.f32 %v1233_v14, %v724_v18  ;;  %v722_v22 = vadd.f32 %v1235_v19, %v1428_v40 }
 0x133   : > { %v1239_v25 = vpop.eup %1238 }
 0x134   : > { %881 = vst.msk [vmem:[%s1447_s22 + $0xc] sm:$0xf] %vm877_vm3, %v1026_v21  ;;  %v1024_v26 = vpack.c.bf16 %v842_v23, %v842_v23  ;;  %v847_v27 = vmul.f32 0.25, %v840_v24  ;;  %v838_v28 = vadd.f32 %v1237_v20, %v722_v22  ;;  %v723_v29 = vadd.f32 %v1239_v25, %v1432_v45  ;;  %v1241_v30 = vpop.eup %1240 }
 0x136   : > { %879 = vst.msk [vmem:[%s1447_s22 + $0x4] sm:$0xf] %vm877_vm3, %v1024_v26  ;;  %v1029_v31 = vpack.c.bf16 %v847_v27, %v847_v27  ;;  %v845_v32 = vmul.f32 0.25, %v838_v28  ;;  %v839_v33 = vadd.f32 %v1241_v30, %v723_v29 }
 0x138   : > { %884 = vst.msk [vmem:[%s1447_s22 + $0x18] sm:$0xf] %vm877_vm3, %v1029_v31  ;;  %v1027_v34 = vpack.c.bf16 %v845_v32, %v845_v32  ;;  %v846_v35 = vmul.f32 0.25, %v839_v33 }
 0x13a   : > { %882 = vst.msk [vmem:[%s1447_s22 + $0x10] sm:$0xf] %vm877_vm3, %v1027_v34  ;;  %v1028_v36 = vpack.c.bf16 %v846_v35, %v846_v35 }
 0x13c   : > { %883 = vst.msk [vmem:[%s1447_s22 + $0x14] sm:$0xf] %vm877_vm3, %v1028_v36 }
 0x13d PF: > { %p10_p9 = scmp.ge.s32.totalorder %s1304_s16, 9   ;;  %s1481_s12 = smov %s1260_s13 }
 0x13e   : > { %s1482_s13 = smov %s1313_s19  ;;  %s1483_s14 = smov %s1304_s16 }
 0x13f   :  { %12 = sbr.rel (!%p10_p9) target bundleno = 2 (0x2), region = 111 }

// kernel: lenet5_forward.4
= control target key start
LH: loop header
LB: loop body
LE: loop exit
PB: predicated region body
PF: predicated region fallthrough
CT: control target
= control target key end

     0   :  { %v879_v0 = vmov 0   ;;  %vm138_vm0 = vcmask 179200   ;;  %vm151_vm1 = vcmask 1042432   ;;  %vm662_vm2 = vcmask 125952   ;;  %s1212_s1 = inlined_call_operand.vmem [shape: bf16[150,16], index: 1, kind: input, shape index: {}]   ;;  %s1213_s0 = inlined_call_operand.vmem [shape: bf16[4,56,150], index: 0, kind: input, shape index: {}]   ;;  %s1214_s2 = inlined_call_operand.vmem [shape: f32[1,16], index: 2, kind: input, shape index: {}]   ;;  %s1215_s3 = inlined_call_operand.vmem [shape: bf16[56,16], index: 3, kind: output, shape index: {}]  }
   0x1   :  { %155 = vmatprep.subr.bf16.mxu0 %v879_v0  ;;  %286 = vmatprep.subr.bf16.mxu1 %v879_v0  ;;  %v905_v1 = vld [vmem:[%s1212_s1] sm:$0xff]   ;;  %v912_v2 = vld [vmem:[%s1212_s1 + $0x8] sm:$0xff]   ;;  %v921_v3 = vld [vmem:[%s1212_s1 + $0x10] sm:$0xff]  }
   0x2   :  { %156 = vmatpush1.bf16.msra.mxu0 %v905_v1  ;;  %287 = vmatpush1.bf16.msra.mxu1 %v905_v1  ;;  %v930_v4 = vld [vmem:[%s1212_s1 + $0x18] sm:$0xff]   ;;  %v781_v5 = vld [vmem:[%s1213_s0 + $0x4] ss:$8 sps:$4 sm:$0xff]   ;;  %v965_v9 = vld [vmem:[%s1212_s1 + $0x30] sm:$0xff]  }
   0x3   :  { %157 = vmatprep.subr.bf16.mxu0 %v879_v0  ;;  %288 = vmatprep.subr.bf16.mxu1 %v879_v0  ;;  %v784_v6 = vld [vmem:[%s1213_s0 + $0x3c] ss:$8 sps:$4 sm:$0xff]   ;;  %v956_v8 = vld [vmem:[%s1212_s1 + $0x28] sm:$0xff]   ;;  %v782_v15 = vld [vmem:[%s1213_s0 + $0x38] ss:$8 sps:$4 sm:$0xff]  }
   0x4   :  { %693 = vmatprep.mubr.msk.bf16.mxu0 %vm138_vm0, %v781_v5  ;;  %v946_v7 = vld [vmem:[%s1212_s1 + $0x20] sm:$0xff]   ;;  %712 = vmatprep.mubr.msk.bf16.mxu1 %vm138_vm0, %v784_v6  ;;  %v974_v10 = vld [vmem:[%s1212_s1 + $0x38] sm:$0xff]   ;;  %v778_v12 = vld [vmem:[%s1212_s1 + $0x48] ss:$0 sps:$4 sm:$0x77]  }
   0x5   :  { %v983_v11 = vld [vmem:[%s1212_s1 + $0x40] sm:$0xff]   ;;  %v994_v13 = vsel %vm151_vm1, %v778_v12, 0  ;;  %v785_v16 = vld [vmem:[%s1213_s0 + $0x14] ss:$8 sps:$4 sm:$0xff]   ;;  %v787_v18 = vld [vmem:[%s1213_s0 + $0x10] ss:$8 sps:$4 sm:$0xff]  }
   0x6   :  { %158 = vmatpush1.bf16.msra.mxu0 %v912_v2  ;;  %289 = vmatpush1.bf16.msra.mxu1 %v912_v2  ;;  %v779_v14 = vld [vmem:[%s1213_s0] ss:$8 sps:$4 sm:$0xff]   ;;  %v788_v17 = vld [vmem:[%s1213_s0 + $0x4c] ss:$8 sps:$4 sm:$0xff]   ;;  %v794_v21 = vld [vmem:[%s1213_s0 + $0x5c] ss:$8 sps:$4 sm:$0xff]  }
   0x7   :  { %159 = vmatprep.subr.bf16.mxu0 %v879_v0  ;;  %290 = vmatprep.subr.bf16.mxu1 %v879_v0  ;;  %v790_v19 = vld [vmem:[%s1213_s0 + $0x48] ss:$8 sps:$4 sm:$0xff]   ;;  %v791_v20 = vld [vmem:[%s1213_s0 + $0x24] ss:$8 sps:$4 sm:$0xff]   ;;  %v796_v23 = vld [vmem:[%s1213_s0 + $0x58] ss:$8 sps:$4 sm:$0xff]  }
   0x8   :  { %v793_v22 = vld [vmem:[%s1213_s0 + $0x20] ss:$8 sps:$4 sm:$0xff]   ;;  %v47_v24 = vld [vmem:[%s1213_s0 + $0x30] sm:$0xff]  ;;  %v807_v34 = vld [vmem:[%s1213_s0 + $0x84] ss:$8 sps:$4 sm:$0xff]  }
   0x9   :  { %v703_v25 = vld [vmem:[%s1213_s0 + $0x68] sm:$0xff]  ;;  %v682_v26 = vcombine.high %v47_v24, %v47_v24  ;;  %v681_v28 = vcombine.low %v47_v24, %v47_v24  ;;  %v803_v30 = vld [vmem:[%s1213_s0 + $0x74] ss:$8 sps:$4 sm:$0xff]   ;;  %v801_v32 = vld [vmem:[%s1213_s0 + $0x70] ss:$8 sps:$4 sm:$0xff]  }
   0xa   :  { %160 = vmatpush1.bf16.msra.mxu0 %v921_v3  ;;  %291 = vmatpush1.bf16.msra.mxu1 %v921_v3  ;;  %v711_v27 = vcombine.high %v703_v25, %v703_v25  ;;  %v710_v29 = vcombine.low %v703_v25, %v703_v25  ;;  %v806_v31 = vld [vmem:[%s1213_s0 + $0xac] ss:$8 sps:$4 sm:$0xff]   ;;  %v804_v33 = vld [vmem:[%s1213_s0 + $0xa8] ss:$8 sps:$4 sm:$0xff]   ;;  %v809_v35 = vld [vmem:[%s1213_s0 + $0xbc] ss:$8 sps:$4 sm:$0xff]  }
   0xb   :  { %161 = vmatprep.subr.bf16.mxu0 %v879_v0  ;;  %292 = vmatprep.subr.bf16.mxu1 %v879_v0  ;;  %v811_v36 = vld [vmem:[%s1213_s0 + $0x80] ss:$8 sps:$4 sm:$0xff]   ;;  %v813_v38 = vld [vmem:[%s1213_s0 + $0x94] ss:$8 sps:$4 sm:$0xff]   ;;  %v817_v42 = vld [vmem:[%s1213_s0 + $0x90] ss:$8 sps:$4 sm:$0xff]  }
   0xc   :  { %v812_v37 = vld [vmem:[%s1213_s0 + $0xb8] ss:$8 sps:$4 sm:$0xff]   ;;  %v815_v39 = vld [vmem:[%s1213_s0 + $0xcc] ss:$8 sps:$4 sm:$0xff]   ;;  %v818_v43 = vld [vmem:[%s1213_s0 + $0xc8] ss:$8 sps:$4 sm:$0xff]  }
   0xd   :  { %v722_v40 = vld [vmem:[%s1213_s0 + $0xa0] sm:$0xff]  ;;  %v741_v41 = vld [vmem:[%s1213_s0 + $0xd8] sm:$0xff] }
   0xe   :  { %162 = vmatpush1.bf16.msra.mxu0 %v930_v4  ;;  %293 = vmatpush1.bf16.msra.mxu1 %v930_v4  ;;  %v730_v44 = vcombine.high %v722_v40, %v722_v40  ;;  %v749_v45 = vcombine.high %v741_v41, %v741_v41  ;;  %v729_v46 = vcombine.low %v722_v40, %v722_v40  ;;  %v1133_v48 = vld [vmem:[%s1214_s2] ss:$0 sm:$0xff] }
   0xf   :  { %163 = vmatprep.subr.bf16.mxu0 %v879_v0  ;;  %294 = vmatprep.subr.bf16.mxu1 %v879_v0  ;;  %v748_v47 = vcombine.low %v741_v41, %v741_v41 }
  0x12   :  { %164 = vmatpush1.bf16.msra.mxu0 %v946_v7  ;;  %295 = vmatpush1.bf16.msra.mxu1 %v946_v7 }
  0x13   :  { %165 = vmatprep.subr.bf16.mxu0 %v879_v0  ;;  %296 = vmatprep.subr.bf16.mxu1 %v879_v0 }
  0x16   :  { %166 = vmatpush1.bf16.msra.mxu0 %v956_v8  ;;  %297 = vmatpush1.bf16.msra.mxu1 %v956_v8 }
  0x17   :  { %167 = vmatprep.subr.bf16.mxu0 %v879_v0  ;;  %298 = vmatprep.subr.bf16.mxu1 %v879_v0 }
  0x1a   :  { %168 = vmatpush1.bf16.msra.mxu0 %v965_v9  ;;  %299 = vmatpush1.bf16.msra.mxu1 %v965_v9 }
  0x1b   :  { %169 = vmatprep.subr.bf16.mxu0 %v879_v0  ;;  %300 = vmatprep.subr.bf16.mxu1 %v879_v0 }
  0x1e   :  { %170 = vmatpush1.bf16.msra.mxu0 %v974_v10  ;;  %301 = vmatpush1.bf16.msra.mxu1 %v974_v10 }
  0x1f   :  { %171 = vmatprep.subr.bf16.mxu0 %v879_v0  ;;  %302 = vmatprep.subr.bf16.mxu1 %v879_v0 }
  0x22   :  { %172 = vmatpush1.bf16.msra.mxu0 %v983_v11  ;;  %303 = vmatpush1.bf16.msra.mxu1 %v983_v11 }
  0x23   :  { %173 = vmatprep.subr.bf16.mxu0 %v879_v0  ;;  %304 = vmatprep.subr.bf16.mxu1 %v879_v0 }
  0x26   :  { %174 = vmatpush1.bf16.msra.mxu0 %v994_v13  ;;  %305 = vmatpush1.bf16.msra.mxu1 %v994_v13 }
  0x27   :  { %417 = vmatprep.subr.bf16.mxu0 %v879_v0  ;;  %548 = vmatprep.subr.bf16.mxu1 %v879_v0 }
  0x29   :  { %188 = vmatmul.mubr.bf16.vlgmr.msra.gmra.mrb[0].mxu0 %v779_v14  ;;  %319 = vmatmul.mubr.bf16.vlgmr.msra.gmra.mrb[0].mxu1 %v782_v15 }
  0x2a   :  { %418 = vmatpush1.bf16.msra.mxu0 %v905_v1  ;;  %549 = vmatpush1.bf16.msra.mxu1 %v905_v1 }
  0x2b   :  { %419 = vmatprep.subr.bf16.mxu0 %v879_v0  ;;  %550 = vmatprep.subr.bf16.mxu1 %v879_v0 }
  0x2c   :  { %694 = vmatprep.mubr.msk.bf16.mxu0 %vm138_vm0, %v785_v16  ;;  %713 = vmatprep.mubr.msk.bf16.mxu1 %vm138_vm0, %v788_v17 }
  0x2e   :  { %420 = vmatpush1.bf16.msra.mxu0 %v912_v2  ;;  %551 = vmatpush1.bf16.msra.mxu1 %v912_v2 }
  0x2f   :  { %421 = vmatprep.subr.bf16.mxu0 %v879_v0  ;;  %552 = vmatprep.subr.bf16.mxu1 %v879_v0 }
  0x31   :  { %196 = vmatmul.mubr.bf16.gmra.mrb[4].mxu0 %v787_v18  ;;  %327 = vmatmul.mubr.bf16.gmra.mrb[4].mxu1 %v790_v19 }
  0x32   :  { %422 = vmatpush1.bf16.msra.mxu0 %v921_v3  ;;  %553 = vmatpush1.bf16.msra.mxu1 %v921_v3 }
  0x33   :  { %423 = vmatprep.subr.bf16.mxu0 %v879_v0  ;;  %554 = vmatprep.subr.bf16.mxu1 %v879_v0 }
  0x34   :  { %695 = vmatprep.mubr.msk.bf16.mxu0 %vm138_vm0, %v791_v20  ;;  %714 = vmatprep.mubr.msk.bf16.mxu1 %vm138_vm0, %v794_v21 }
  0x36   :  { %424 = vmatpush1.bf16.msra.mxu0 %v930_v4  ;;  %555 = vmatpush1.bf16.msra.mxu1 %v930_v4 }
  0x37   :  { %425 = vmatprep.subr.bf16.mxu0 %v879_v0  ;;  %556 = vmatprep.subr.bf16.mxu1 %v879_v0 }
  0x39   :  { %204 = vmatmul.mubr.bf16.gmra.mrb[8].mxu0 %v793_v22  ;;  %335 = vmatmul.mubr.bf16.gmra.mrb[8].mxu1 %v796_v23 }
  0x3a   :  { %426 = vmatpush1.bf16.msra.mxu0 %v946_v7  ;;  %557 = vmatpush1.bf16.msra.mxu1 %v946_v7 }
  0x3b   :  { %427 = vmatprep.subr.bf16.mxu0 %v879_v0  ;;  %558 = vmatprep.subr.bf16.mxu1 %v879_v0 }
  0x3c   :  { %696 = vmatprep.mubr.msk.bf16.mxu0 %vm138_vm0, %v682_v26  ;;  %715 = vmatprep.mubr.msk.bf16.mxu1 %vm138_vm0, %v711_v27 }
  0x3e   :  { %428 = vmatpush1.bf16.msra.mxu0 %v956_v8  ;;  %559 = vmatpush1.bf16.msra.mxu1 %v956_v8 }
  0x3f   :  { %429 = vmatprep.subr.bf16.mxu0 %v879_v0  ;;  %560 = vmatprep.subr.bf16.mxu1 %v879_v0 }
  0x41   :  { %212 = vmatmul.mubr.bf16.gmra.mrb[12].mxu0 %v681_v28  ;;  %343 = vmatmul.mubr.bf16.gmra.mrb[12].mxu1 %v710_v29 }
  0x42   :  { %430 = vmatpush1.bf16.msra.mxu0 %v965_v9  ;;  %561 = vmatpush1.bf16.msra.mxu1 %v965_v9 }
  0x43   :  { %431 = vmatprep.subr.bf16.mxu0 %v879_v0  ;;  %562 = vmatprep.subr.bf16.mxu1 %v879_v0 }
  0x44   :  { %731 = vmatprep.mubr.msk.bf16.mxu0 %vm138_vm0, %v803_v30  ;;  %750 = vmatprep.mubr.msk.bf16.mxu1 %vm138_vm0, %v806_v31 }
  0x46   :  { %432 = vmatpush1.bf16.msra.mxu0 %v974_v10  ;;  %563 = vmatpush1.bf16.msra.mxu1 %v974_v10 }
  0x47   :  { %433 = vmatprep.subr.bf16.mxu0 %v879_v0  ;;  %564 = vmatprep.subr.bf16.mxu1 %v879_v0 }
  0x4a   :  { %434 = vmatpush1.bf16.msra.mxu0 %v983_v11  ;;  %565 = vmatpush1.bf16.msra.mxu1 %v983_v11 }
  0x4b   :  { %435 = vmatprep.subr.bf16.mxu0 %v879_v0  ;;  %566 = vmatprep.subr.bf16.mxu1 %v879_v0 }
  0x4e   :  { %436 = vmatpush1.bf16.msra.mxu0 %v994_v13  ;;  %567 = vmatpush1.bf16.msra.mxu1 %v994_v13 }
  0x51   :  { %450 = vmatmul.mubr.bf16.vlgmr.msra.gmra.mrb[16].mxu0 %v801_v32  ;;  %581 = vmatmul.mubr.bf16.vlgmr.msra.gmra.mrb[16].mxu1 %v804_v33 }
  0x52   :  { %732 = vmatprep.mubr.msk.bf16.mxu0 %vm138_vm0, %v807_v34  ;;  %751 = vmatprep.mubr.msk.bf16.mxu1 %vm138_vm0, %v809_v35 }
  0x59   :  { %458 = vmatmul.mubr.bf16.gmra.mrb[20].mxu0 %v811_v36  ;;  %589 = vmatmul.mubr.bf16.gmra.mrb[20].mxu1 %v812_v37 }
  0x5a   :  { %733 = vmatprep.mubr.msk.bf16.mxu0 %vm138_vm0, %v813_v38  ;;  %752 = vmatprep.mubr.msk.bf16.mxu1 %vm138_vm0, %v815_v39 }
  0x61   :  { %466 = vmatmul.mubr.bf16.gmra.mrb[24].mxu0 %v817_v42  ;;  %597 = vmatmul.mubr.bf16.gmra.mrb[24].mxu1 %v818_v43 }
  0x62   :  { %734 = vmatprep.mubr.msk.bf16.mxu0 %vm138_vm0, %v730_v44  ;;  %753 = vmatprep.mubr.msk.bf16.mxu1 %vm138_vm0, %v749_v45 }
  0x69   :  { %474 = vmatmul.mubr.bf16.gmra.mrb[28].mxu0 %v729_v46  ;;  %605 = vmatmul.mubr.bf16.gmra.mrb[28].mxu1 %v748_v47 }
  0xfc   :  { %v189_v49 = vpop.f32.mrb[0].mxu0  ;;  %v320_v50 = vpop.f32.mrb[0].mxu1 }
  0xfd   :  { %v190_v51 = vadd.f32 %v1133_v48, %v189_v49  ;;  %v321_v52 = vadd.f32 %v1133_v48, %v320_v50  ;;  %v191_v53 = vpop.f32.mrb[1].mxu0  ;;  %v322_v54 = vpop.f32.mrb[1].mxu1 }
  0xfe   :  { %v192_v55 = vpop.f32.mrb[2].mxu0  ;;  %v323_v56 = vpop.f32.mrb[2].mxu1 }
  0xff   :  { %823 = vtanh.f32 %v190_v51  ;;  %v193_v57 = vadd.f32 %v1133_v48, %v192_v55  ;;  %v324_v58 = vadd.f32 %v1133_v48, %v323_v56  ;;  %v194_v59 = vpop.f32.mrb[3].mxu0  ;;  %v325_v60 = vpop.f32.mrb[3].mxu1 }
 0x100   :  { %825 = vtanh.f32 %v321_v52 }
 0x101   :  { %827 = vtanh.f32 %v193_v57 }
 0x102   :  { %829 = vtanh.f32 %v324_v58 }
 0x104   :  { %v197_v61 = vpop.f32.mrb[4].mxu0  ;;  %v328_v62 = vpop.f32.mrb[4].mxu1 }
 0x105   :  { %v198_v63 = vadd.f32 %v1133_v48, %v197_v61  ;;  %v199_v0 = vpop.f32.mrb[5].mxu0  ;;  %v329_v1 = vadd.f32 %v1133_v48, %v328_v62  ;;  %v330_v2 = vpop.f32.mrb[5].mxu1 }
 0x106   :  { %v200_v3 = vpop.f32.mrb[6].mxu0  ;;  %v331_v4 = vpop.f32.mrb[6].mxu1 }
 0x107   :  { %831 = vtanh.f32 %v198_v63  ;;  %v201_v5 = vadd.f32 %v1133_v48, %v200_v3  ;;  %v202_v6 = vpop.f32.mrb[7].mxu0  ;;  %v332_v7 = vadd.f32 %v1133_v48, %v331_v4  ;;  %v333_v8 = vpop.f32.mrb[7].mxu1 }
 0x108   :  { %833 = vtanh.f32 %v329_v1 }
 0x109   :  { %v824_v9 = vpop.eup %823  ;;  %835 = vtanh.f32 %v201_v5 }
 0x10a   :  { %v826_v10 = vpop.eup %825  ;;  %837 = vtanh.f32 %v332_v7 }
 0x10b   :  { %v828_v11 = vpop.eup %827  ;;  %v1143_v12 = vadd.f32 %v826_v10, %v824_v9 }
 0x10c   :  { %v830_v13 = vpop.eup %829  ;;  %v205_v14 = vpop.f32.mrb[8].mxu0 }
 0x10d   :  { %v336_v15 = vpop.f32.mrb[8].mxu1  ;;  %v1145_v16 = vadd.f32 %v830_v13, %v828_v11  ;;  %v206_v17 = vadd.f32 %v1133_v48, %v205_v14  ;;  %v207_v18 = vpop.f32.mrb[9].mxu0 }
 0x10e   :  { %v337_v19 = vadd.f32 %v1133_v48, %v336_v15  ;;  %v338_v20 = vpop.f32.mrb[9].mxu1  ;;  %v208_v21 = vpop.f32.mrb[10].mxu0 }
 0x10f   :  { %v339_v22 = vpop.f32.mrb[10].mxu1  ;;  %839 = vtanh.f32 %v206_v17  ;;  %v209_v23 = vadd.f32 %v1133_v48, %v208_v21  ;;  %v210_v24 = vpop.f32.mrb[11].mxu0 }
 0x110   :  { %v340_v25 = vadd.f32 %v1133_v48, %v339_v22  ;;  %v341_v26 = vpop.f32.mrb[11].mxu1  ;;  %841 = vtanh.f32 %v337_v19 }
 0x111   :  { %v832_v27 = vpop.eup %831  ;;  %843 = vtanh.f32 %v209_v23 }
 0x112   :  { %v834_v28 = vpop.eup %833  ;;  %845 = vtanh.f32 %v340_v25 }
 0x113   :  { %v836_v29 = vpop.eup %835  ;;  %v1151_v30 = vadd.f32 %v834_v28, %v832_v27 }
 0x114   :  { %v838_v31 = vpop.eup %837  ;;  %v213_v32 = vpop.f32.mrb[12].mxu0 }
 0x115   :  { %v344_v33 = vpop.f32.mrb[12].mxu1  ;;  %v1153_v34 = vadd.f32 %v838_v31, %v836_v29  ;;  %v214_v35 = vadd.f32 %v1133_v48, %v213_v32  ;;  %v215_v36 = vpop.f32.mrb[13].mxu0 }
 0x116   :  { %v345_v37 = vadd.f32 %v1133_v48, %v344_v33  ;;  %v346_v38 = vpop.f32.mrb[13].mxu1  ;;  %v216_v39 = vpop.f32.mrb[14].mxu0 }
 0x117   :  { %v347_v40 = vpop.f32.mrb[14].mxu1  ;;  %847 = vtanh.f32 %v214_v35  ;;  %v217_v41 = vpop.f32.mrb[15].mxu0 }
 0x118   :  { %v348_v42 = vpop.f32.mrb[15].mxu1  ;;  %849 = vtanh.f32 %v345_v37 }
 0x119   :  { %v840_v43 = vpop.eup %839 }
 0x11a   :  { %v842_v44 = vpop.eup %841 }
 0x11b   :  { %v844_v45 = vpop.eup %843  ;;  %v1157_v46 = vadd.f32 %v842_v44, %v840_v43 }
 0x11c   :  { %v846_v47 = vpop.eup %845 }
 0x11d   :  { %v1159_v49 = vadd.f32 %v846_v47, %v844_v45 }
 0x121   :  { %v848_v50 = vpop.eup %847 }
 0x122   :  { %v850_v51 = vpop.eup %849 }
 0x123   :  { %v1161_v52 = vadd.f32 %v850_v51, %v848_v50 }
 0x124   :  { %v451_v53 = vpop.f32.mrb[16].mxu0  ;;  %v582_v54 = vpop.f32.mrb[16].mxu1 }
 0x125   :  { %v452_v55 = vadd.f32 %v1133_v48, %v451_v53  ;;  %v583_v56 = vadd.f32 %v1133_v48, %v582_v54  ;;  %v453_v57 = vpop.f32.mrb[17].mxu0  ;;  %v584_v58 = vpop.f32.mrb[17].mxu1 }
 0x126   :  { %v454_v59 = vpop.f32.mrb[18].mxu0  ;;  %v585_v60 = vpop.f32.mrb[18].mxu1 }
 0x127   :  { %851 = vtanh.f32 %v452_v55  ;;  %v455_v61 = vadd.f32 %v1133_v48, %v454_v59  ;;  %v586_v62 = vadd.f32 %v1133_v48, %v585_v60  ;;  %v456_v63 = vpop.f32.mrb[19].mxu0  ;;  %v587_v0 = vpop.f32.mrb[19].mxu1 }
 0x128   :  { %853 = vtanh.f32 %v583_v56 }
 0x129   :  { %855 = vtanh.f32 %v455_v61 }
 0x12a   :  { %857 = vtanh.f32 %v586_v62 }
 0x12c   :  { %v459_v1 = vpop.f32.mrb[20].mxu0  ;;  %v590_v2 = vpop.f32.mrb[20].mxu1 }
 0x12d   :  { %v460_v3 = vadd.f32 %v1133_v48, %v459_v1  ;;  %v591_v4 = vadd.f32 %v1133_v48, %v590_v2  ;;  %v461_v5 = vpop.f32.mrb[21].mxu0  ;;  %v592_v6 = vpop.f32.mrb[21].mxu1 }
 0x12e   :  { %v462_v7 = vpop.f32.mrb[22].mxu0  ;;  %v593_v8 = vpop.f32.mrb[22].mxu1 }
 0x12f   :  { %859 = vtanh.f32 %v460_v3  ;;  %v463_v9 = vadd.f32 %v1133_v48, %v462_v7  ;;  %v594_v10 = vadd.f32 %v1133_v48, %v593_v8  ;;  %v464_v11 = vpop.f32.mrb[23].mxu0  ;;  %v595_v13 = vpop.f32.mrb[23].mxu1 }
 0x130   :  { %861 = vtanh.f32 %v591_v4 }
 0x131   :  { %v852_v14 = vpop.eup %851  ;;  %863 = vtanh.f32 %v463_v9 }
 0x132   :  { %v854_v15 = vpop.eup %853  ;;  %v488_v17 = vadd.f32 %v852_v14, %v1143_v12  ;;  %865 = vtanh.f32 %v594_v10 }
 0x133   :  { %v856_v18 = vpop.eup %855 }
 0x134   :  { %v619_v19 = vadd.f32 %v854_v15, %v488_v17  ;;  %v489_v20 = vadd.f32 %v856_v18, %v1145_v16  ;;  %v467_v21 = vpop.f32.mrb[24].mxu0  ;;  %v598_v22 = vpop.f32.mrb[24].mxu1 }
 0x135   :  { %v858_v23 = vpop.eup %857  ;;  %v468_v24 = vadd.f32 %v1133_v48, %v467_v21  ;;  %v599_v25 = vadd.f32 %v1133_v48, %v598_v22  ;;  %v469_v26 = vpop.f32.mrb[25].mxu0 }
 0x136   :  { %v600_v27 = vpop.f32.mrb[25].mxu1  ;;  %v626_v28 = vmul.f32 0.25, %v619_v19  ;;  %v620_v29 = vadd.f32 %v858_v23, %v489_v20  ;;  %v470_v31 = vpop.f32.mrb[26].mxu0 }
 0x137   :  { %v601_v32 = vpop.f32.mrb[26].mxu1  ;;  %867 = vtanh.f32 %v468_v24  ;;  %v471_v12 = vadd.f32 %v1133_v48, %v470_v31  ;;  %v472_v16 = vpop.f32.mrb[27].mxu0 }
 0x138   :  { %v602_v33 = vadd.f32 %v1133_v48, %v601_v32  ;;  %v603_v35 = vpop.f32.mrb[27].mxu1  ;;  %v761_v36 = vpack.c.bf16 %v626_v28, %v626_v28  ;;  %v627_v37 = vmul.f32 0.25, %v620_v29  ;;  %869 = vtanh.f32 %v599_v25 }
 0x139   :  { %v860_v38 = vpop.eup %859  ;;  %871 = vtanh.f32 %v471_v12 }
 0x13a   :  { %v862_v39 = vpop.eup %861  ;;  %663 = vst.msk [vmem:[%s1215_s3] sm:$0xf] %vm662_vm2, %v761_v36  ;;  %v762_v40 = vpack.c.bf16 %v627_v37, %v627_v37  ;;  %v490_v41 = vadd.f32 %v860_v38, %v1151_v30  ;;  %873 = vtanh.f32 %v602_v33 }
 0x13b   :  { %v864_v42 = vpop.eup %863 }
 0x13c   :  { %664 = vst.msk [vmem:[%s1215_s3 + $0x4] sm:$0xf] %vm662_vm2, %v762_v40  ;;  %v621_v43 = vadd.f32 %v862_v39, %v490_v41  ;;  %v491_v44 = vadd.f32 %v864_v42, %v1153_v34  ;;  %v475_v45 = vpop.f32.mrb[28].mxu0  ;;  %v606_v47 = vpop.f32.mrb[28].mxu1 }
 0x13d   :  { %v866_v50 = vpop.eup %865  ;;  %v476_v51 = vadd.f32 %v1133_v48, %v475_v45  ;;  %v607_v53 = vadd.f32 %v1133_v48, %v606_v47  ;;  %v477_v54 = vpop.f32.mrb[29].mxu0 }
 0x13e   :  { %v608_v55 = vpop.f32.mrb[29].mxu1  ;;  %v628_v30 = vmul.f32 0.25, %v621_v43  ;;  %v622_v56 = vadd.f32 %v866_v50, %v491_v44  ;;  %v478_v57 = vpop.f32.mrb[30].mxu0 }
 0x13f   :  { %v609_v58 = vpop.f32.mrb[30].mxu1  ;;  %875 = vtanh.f32 %v476_v51  ;;  %v479_v59 = vpop.f32.mrb[31].mxu0 }
 0x140   :  { %v610_v60 = vpop.f32.mrb[31].mxu1  ;;  %v763_v61 = vpack.c.bf16 %v628_v30, %v628_v30  ;;  %v629_v62 = vmul.f32 0.25, %v622_v56  ;;  %877 = vtanh.f32 %v607_v53 }
 0x141   :  { %v868_v34 = vpop.eup %867 }
 0x142   :  { %v870_v63 = vpop.eup %869  ;;  %665 = vst.msk [vmem:[%s1215_s3 + $0x8] sm:$0xf] %vm662_vm2, %v763_v61  ;;  %v764_v48 = vpack.c.bf16 %v629_v62, %v629_v62  ;;  %v492_v0 = vadd.f32 %v868_v34, %v1157_v46 }
 0x143   :  { %v872_v1 = vpop.eup %871 }
 0x144   :  { %666 = vst.msk [vmem:[%s1215_s3 + $0xc] sm:$0xf] %vm662_vm2, %v764_v48  ;;  %v623_v2 = vadd.f32 %v870_v63, %v492_v0  ;;  %v493_v3 = vadd.f32 %v872_v1, %v1159_v49  ;;  %v874_v4 = vpop.eup %873 }
 0x146   :  { %v630_v5 = vmul.f32 0.25, %v623_v2  ;;  %v624_v6 = vadd.f32 %v874_v4, %v493_v3 }
 0x148   :  { %v765_v7 = vpack.c.bf16 %v630_v5, %v630_v5  ;;  %v631_v8 = vmul.f32 0.25, %v624_v6 }
 0x149   :  { %v876_v9 = vpop.eup %875 }
 0x14a   :  { %v878_v10 = vpop.eup %877  ;;  %667 = vst.msk [vmem:[%s1215_s3 + $0x10] sm:$0xf] %vm662_vm2, %v765_v7  ;;  %v766_v46 = vpack.c.bf16 %v631_v8, %v631_v8  ;;  %v494_v11 = vadd.f32 %v876_v9, %v1161_v52 }
 0x14c   :  { %668 = vst.msk [vmem:[%s1215_s3 + $0x14] sm:$0xf] %vm662_vm2, %v766_v46  ;;  %v625_v49 = vadd.f32 %v878_v10, %v494_v11 }
 0x14e   :  { %v632_v13 = vmul.f32 0.25, %v625_v49 }
 0x150   :  { %v767_v14 = vpack.c.bf16 %v632_v13, %v632_v13 }
 0x152   :  { %669 = vst.msk [vmem:[%s1215_s3 + $0x18] sm:$0xf] %vm662_vm2, %v767_v14 }

// kernel: lenet5_forward.5
= control target key start
LH: loop header
LB: loop body
LE: loop exit
PB: predicated region body
PF: predicated region fallthrough
CT: control target
= control target key end

     0   :  { %v745_v0 = vmov 0   ;;  %vm249_vm0 = vcmask 130048   ;;  %v746_v32 = vmov 0.0   ;;  %vm747_vm1 = vmmov 0   ;;  %s956_s1 = inlined_call_operand.vmem [shape: bf16[400,128], index: 1, kind: input, shape index: {}]   ;;  %s957_s0 = inlined_call_operand.vmem [shape: bf16[8,400], index: 0, kind: input, shape index: {}]   ;;  %s958_s3 = inlined_call_operand.vmem [shape: bf16[128,128], index: 3, kind: input, shape index: {}]   ;;  %s959_s5 = inlined_call_operand.vmem [shape: bf16[128,128], index: 5, kind: input, shape index: {}]   ;;  %s960_s2 = inlined_call_operand.vmem [shape: f32[1,128], index: 2, kind: input, shape index: {}]   ;;  %s961_s4 = inlined_call_operand.vmem [shape: f32[1,128], index: 4, kind: input, shape index: {}]   ;;  %s962_s6 = inlined_call_operand.vmem [shape: f32[1,128], index: 6, kind: input, shape index: {}]   ;;  %s963_s7 = inlined_call_operand.vmem [shape: f32[8,128], index: 7, kind: output, shape index: {}]  }
   0x1   :  { %293 = vmatprep.subr.bf16.mxu1 %v745_v0  ;;  %v696_v1 = vld [vmem:[%s956_s1 + $0x40] sm:$0xff]   ;;  %v699_v4 = vld [vmem:[%s956_s1 + $0x48] sm:$0xff]   ;;  %v702_v7 = vld [vmem:[%s956_s1 + $0x50] sm:$0xff]  }
   0x2   :  { %v697_v2 = vld [vmem:[%s956_s1 + $0x80] sm:$0xff]   ;;  %613 = vmatprep.subr.bf16.mxu0 %v696_v1  ;;  %v700_v5 = vld [vmem:[%s956_s1 + $0x88] sm:$0xff]   ;;  %v703_v8 = vld [vmem:[%s956_s1 + $0x90] sm:$0xff]  }
   0x3   :  { %v698_v3 = vld [vmem:[%s956_s1] sm:$0xff]   ;;  %294 = vmatpush1.bf16.msra.mxu1 %v697_v2  ;;  %v701_v6 = vld [vmem:[%s956_s1 + $0x8] sm:$0xff]   ;;  %v704_v9 = vld [vmem:[%s956_s1 + $0x10] sm:$0xff]  }
   0x4   :  { %614 = vmatpush3.bf16.msra.mxu0 %v698_v3  ;;  %295 = vmatprep.subr.bf16.mxu1 %v745_v0  ;;  %v705_v10 = vld [vmem:[%s956_s1 + $0x58] sm:$0xff]   ;;  %v708_v13 = vld [vmem:[%s956_s1 + $0x60] sm:$0xff]   ;;  %v711_v16 = vld [vmem:[%s956_s1 + $0x68] sm:$0xff]  }
   0x5   :  { %615 = vmatprep.subr.bf16.mxu0 %v699_v4  ;;  %v706_v11 = vld [vmem:[%s956_s1 + $0x98] sm:$0xff]   ;;  %v709_v14 = vld [vmem:[%s956_s1 + $0xa0] sm:$0xff]   ;;  %v712_v17 = vld [vmem:[%s956_s1 + $0xa8] sm:$0xff]  }
   0x6   :  { %v707_v12 = vld [vmem:[%s956_s1 + $0x18] sm:$0xff]   ;;  %v710_v15 = vld [vmem:[%s956_s1 + $0x20] sm:$0xff]   ;;  %v713_v18 = vld [vmem:[%s956_s1 + $0x28] sm:$0xff]  }
   0x7   :  { %296 = vmatpush1.bf16.msra.mxu1 %v700_v5  ;;  %v714_v19 = vld [vmem:[%s956_s1 + $0x70] sm:$0xff]   ;;  %v27_v22 = vld [vmem:[%s957_s0] sm:$0xff]  ;;  %v717_v23 = vld [vmem:[%s956_s1 + $0x78] sm:$0xff]  }
   0x8   :  { %616 = vmatpush3.bf16.msra.mxu0 %v701_v6  ;;  %297 = vmatprep.subr.bf16.mxu1 %v745_v0  ;;  %v715_v20 = vld [vmem:[%s956_s1 + $0xb0] sm:$0xff]   ;;  %v566_v24 = vcombine.high %v27_v22, %v27_v22  ;;  %v28_v25 = vld [vmem:[%s957_s0 + $0x8] sm:$0xff]  ;;  %v718_v27 = vld [vmem:[%s956_s1 + $0xb8] sm:$0xff]   ;;  %v565_v30 = vcombine.low %v27_v22, %v27_v22 }
   0x9   :  { %617 = vmatprep.subr.bf16.mxu0 %v702_v7  ;;  %v716_v21 = vld [vmem:[%s956_s1 + $0x30] sm:$0xff]   ;;  %v568_v26 = vcombine.high %v28_v25, %v28_v25  ;;  %v719_v28 = vld [vmem:[%s956_s1 + $0x38] sm:$0xff]   ;;  %v722_v29 = vld [vmem:[%s956_s1 + $0xc0] sm:$0xff]   ;;  %v567_v33 = vcombine.low %v28_v25, %v28_v25 }
   0xa   :  { %285 = vmatprep.mubr.bf16.mxu0 %v566_v24  ;;  %v725_v31 = vld [vmem:[%s958_s3] sm:$0xff]   ;;  %v726_v34 = vld [vmem:[%s958_s3 + $0x8] sm:$0xff]   ;;  %v727_v35 = vld [vmem:[%s958_s3 + $0x10] sm:$0xff]  }
   0xb   :  { %298 = vmatpush1.bf16.msra.mxu1 %v703_v8  ;;  %594 = vmatprep.mubr.msk.bf16.mxu1 %vm249_vm0, %v568_v26  ;;  %v728_v36 = vld [vmem:[%s958_s3 + $0x18] sm:$0xff]   ;;  %v729_v37 = vld [vmem:[%s958_s3 + $0x20] sm:$0xff]   ;;  %v730_v38 = vld [vmem:[%s958_s3 + $0x28] sm:$0xff]  }
   0xc   :  { %618 = vmatpush3.bf16.msra.mxu0 %v704_v9  ;;  %299 = vmatprep.subr.bf16.mxu1 %v745_v0  ;;  %v731_v39 = vld [vmem:[%s958_s3 + $0x30] sm:$0xff]   ;;  %v732_v40 = vld [vmem:[%s958_s3 + $0x38] sm:$0xff]   ;;  %v733_v41 = vld [vmem:[%s959_s5] sm:$0xff]  }
   0xd   :  { %619 = vmatprep.subr.bf16.mxu0 %v705_v10  ;;  %v734_v42 = vld [vmem:[%s959_s5 + $0x8] sm:$0xff]   ;;  %v735_v43 = vld [vmem:[%s959_s5 + $0x10] sm:$0xff]   ;;  %v736_v44 = vld [vmem:[%s959_s5 + $0x18] sm:$0xff]  }
   0xe   :  { %v564_v47 = vld [vmem:[%s960_s2] ss:$0 sm:$0xff]  ;;  %v738_v60 = vld [vmem:[%s959_s5 + $0x28] sm:$0xff]   ;;  %v739_v61 = vld [vmem:[%s959_s5 + $0x30] sm:$0xff]  }
   0xf   :  { %300 = vmatpush1.bf16.msra.mxu1 %v706_v11  ;;  %v737_v59 = vld [vmem:[%s959_s5 + $0x20] sm:$0xff]   ;;  %v740_v62 = vld [vmem:[%s959_s5 + $0x38] sm:$0xff]  }
  0x10   :  { %620 = vmatpush3.bf16.msra.mxu0 %v707_v12  ;;  %301 = vmatprep.subr.bf16.mxu1 %v745_v0  ;;  %v595_v63 = vld [vmem:[%s961_s4] ss:$0 sm:$0xff] }
  0x11   :  { %621 = vmatprep.subr.bf16.mxu0 %v708_v13  ;;  %v604_v7 = vld [vmem:[%s962_s6] ss:$0 sm:$0xff] }
  0x13   :  { %302 = vmatpush1.bf16.msra.mxu1 %v709_v14 }
  0x14   :  { %622 = vmatpush3.bf16.msra.mxu0 %v710_v15  ;;  %303 = vmatprep.subr.bf16.mxu1 %v745_v0 }
  0x15   :  { %623 = vmatprep.subr.bf16.mxu0 %v711_v16 }
  0x17   :  { %304 = vmatpush1.bf16.msra.mxu1 %v712_v17 }
  0x18   :  { %624 = vmatpush3.bf16.msra.mxu0 %v713_v18  ;;  %305 = vmatprep.subr.bf16.mxu1 %v745_v0 }
  0x19   :  { %625 = vmatprep.subr.bf16.mxu0 %v714_v19 }
  0x1b   :  { %306 = vmatpush1.bf16.msra.mxu1 %v715_v20 }
  0x1c   :  { %626 = vmatpush3.bf16.msra.mxu0 %v716_v21  ;;  %307 = vmatprep.subr.bf16.mxu1 %v745_v0 }
  0x1d   :  { %627 = vmatprep.subr.bf16.mxu0 %v717_v23 }
  0x1f   :  { %308 = vmatpush1.bf16.msra.mxu1 %v718_v27 }
  0x20   :  { %628 = vmatpush3.bf16.msra.mxu0 %v719_v28  ;;  %309 = vmatprep.subr.bf16.mxu1 %v745_v0 }
  0x21   :  { %653 = vmatprep.subr.bf16.mxu0 %v746_v32 }
  0x23   :  { %286 = vmatmul.mubr.bf16.vlgmr.msra.gmra.mrb[0].mxu0 %v565_v30  ;;  %310 = vmatpush1.bf16.msra.mxu1 %v722_v29 }
  0x24   :  { %654 = vmatpush3.bf16.msra.mxu0 %v725_v31  ;;  %673 = vmatprep.subr.bf16.mxu1 %v746_v32 }
  0x25   :  { %655 = vmatprep.subr.bf16.mxu0 %v746_v32  ;;  %669 = vmatprep.mubr.msk.bf16.mxu0 %vm747_vm1, %v746_v32 }
  0x26   :  { %326 = vmatmul.mubr.bf16.vlgmr.msra.gmra.mrb[0].mxu1 %v567_v33 }
  0x27   :  { %689 = vmatprep.mubr.msk.bf16.mxu1 %vm747_vm1, %v746_v32  ;;  %674 = vmatpush3.bf16.msra.mxu1 %v733_v41 }
  0x28   :  { %656 = vmatpush3.bf16.msra.mxu0 %v726_v34  ;;  %675 = vmatprep.subr.bf16.mxu1 %v746_v32 }
  0x29   :  { %657 = vmatprep.subr.bf16.mxu0 %v746_v32 }
  0x2b   :  { %676 = vmatpush3.bf16.msra.mxu1 %v734_v42 }
  0x2c   :  { %658 = vmatpush3.bf16.msra.mxu0 %v727_v35  ;;  %677 = vmatprep.subr.bf16.mxu1 %v746_v32 }
  0x2d   :  { %659 = vmatprep.subr.bf16.mxu0 %v746_v32 }
  0x2f   :  { %678 = vmatpush3.bf16.msra.mxu1 %v735_v43 }
  0x30   :  { %660 = vmatpush3.bf16.msra.mxu0 %v728_v36  ;;  %679 = vmatprep.subr.bf16.mxu1 %v746_v32 }
  0x31   :  { %661 = vmatprep.subr.bf16.mxu0 %v746_v32 }
  0x33   :  { %680 = vmatpush3.bf16.msra.mxu1 %v736_v44 }
  0x34   :  { %662 = vmatpush3.bf16.msra.mxu0 %v729_v37  ;;  %681 = vmatprep.subr.bf16.mxu1 %v746_v32 }
  0x35   :  { %663 = vmatprep.subr.bf16.mxu0 %v746_v32 }
  0x37   :  { %682 = vmatpush3.bf16.msra.mxu1 %v737_v59 }
  0x38   :  { %664 = vmatpush3.bf16.msra.mxu0 %v730_v38  ;;  %683 = vmatprep.subr.bf16.mxu1 %v746_v32 }
  0x39   :  { %665 = vmatprep.subr.bf16.mxu0 %v746_v32 }
  0x3b   :  { %684 = vmatpush3.bf16.msra.mxu1 %v738_v60 }
  0x3c   :  { %666 = vmatpush3.bf16.msra.mxu0 %v731_v39  ;;  %685 = vmatprep.subr.bf16.mxu1 %v746_v32 }
  0x3d   :  { %667 = vmatprep.subr.bf16.mxu0 %v746_v32 }
  0x3f   :  { %686 = vmatpush3.bf16.msra.mxu1 %v739_v61 }
  0x40   :  { %668 = vmatpush3.bf16.msra.mxu0 %v732_v40  ;;  %687 = vmatprep.subr.bf16.mxu1 %v746_v32 }
  0x43   :  { %688 = vmatpush3.bf16.msra.mxu1 %v740_v62 }
  0xf6   :  { %v629_v45 = vpop.f32.mrb[0].mxu0 }
  0xf7   :  { %v630_v46 = vpop.f32.mrb[1].mxu0 }
  0xf8   :  { %v631_v48 = vadd.f32 %v630_v46, %v629_v45  ;;  %v632_v49 = vpop.f32.mrb[2].mxu0 }
  0xf9   :  { %v633_v50 = vpop.f32.mrb[3].mxu0  ;;  %v327_v51 = vpop.f32.mrb[0].mxu1 }
  0xfa   :  { %v288_v52 = vadd.f32 %v631_v48, %v564_v47  ;;  %v329_v53 = vpop.f32.mrb[1].mxu1 }
  0xfb   :  { %v330_v54 = vpop.f32.mrb[2].mxu1 }
  0xfc   :  { %v328_v55 = vadd.f32 %v327_v51, %v288_v52  ;;  %v331_v56 = vpop.f32.mrb[3].mxu1 }
  0xfe   :  { %741 = vtanh.f32 %v328_v55 }
 0x108   :  { %v742_v57 = vpop.eup %741 }
 0x109   :  { %v334_v58 = vpack.c.bf16 %v742_v57, %v742_v57 }
 0x10b   :  { %670 = vmatmul.mubr.bf16.vlgmr.msra.gmra.mrb[4].mxu0 %v334_v58 }
 0x1de   :  { %v440_v0 = vpop.f32.mrb[4].mxu0 }
 0x1df   :  { %v441_v1 = vadd.f32 %v595_v63, %v440_v0  ;;  %v671_v2 = vpop.f32.mrb[5].mxu0 }
 0x1e0   :  { %v443_v3 = vpop.f32.mrb[6].mxu0 }
 0x1e1   :  { %743 = vtanh.f32 %v441_v1  ;;  %v672_v4 = vpop.f32.mrb[7].mxu0 }
 0x1eb   :  { %v744_v5 = vpop.eup %743 }
 0x1ec   :  { %v447_v6 = vpack.c.bf16 %v744_v5, %v744_v5 }
 0x1ee   :  { %690 = vmatmul.mubr.bf16.vlgmr.msra.gmra.mrb[4].mxu1 %v447_v6 }
 0x2c1   :  { %v553_v8 = vpop.f32.mrb[4].mxu1 }
 0x2c2   :  { %v554_v9 = vadd.f32 %v604_v7, %v553_v8  ;;  %v691_v10 = vpop.f32.mrb[5].mxu1 }
 0x2c3   :  { %v556_v11 = vpop.f32.mrb[6].mxu1 }
 0x2c4   :  { %559 = vst [vmem:[%s963_s7] sm:$0xff] %v554_v9  ;;  %v692_v12 = vpop.f32.mrb[7].mxu1 }

</bundles_post_ra>
